<compile_context>
chip_gen: v6e
topology: v6e:2x2x1
jax: 0.10.0
libtpu: 0.0.40
codegen_flags: <defaults>
</compile_context>

<pallas_src>
import functools

import jax
import jax.numpy as jnp
from jax import lax
from jax.experimental import pallas as pl
from jax.experimental.pallas import tpu as pltpu

BETA = 0.05
EPS = 1e-12          # F.normalize eps
NEG_BIG = -1e30      # finite "minus infinity" for masked logits (keep finite!)


def _cdiv(a, b):
    return -(-a // b)


def _default_num_splits():
    # v7x has 2 TensorCores per chip; the leading "parallel" grid axis shards
    # the L-reduction across them.  Single-TC chips (v5e/v6e) use 1 split.
    try:
        kind = jax.devices()[0].device_kind.lower()
    except Exception:
        return 1
    return 2 if "v7" in kind else 1


def _queue_loss_kernel(xs_ref, em_ref, blab_ref, lab_ref, out_ref,
                       m_sc, l_sc, s_sc, c_sc,
                       *, tile_l, tiles_per_split, l_total):
    split = pl.program_id(0)          # L-split (parallel axis)
    k = pl.program_id(1)              # tile within the split (reduction axis)
    tile_idx = split * tiles_per_split + k   # UN-clamped logical tile index

    @pl.when(k == 0)
    def _():
        # per-split accumulators live in VMEM scratch, flushed once at the end
        m_sc[...] = jnp.full(m_sc.shape, -jnp.inf, jnp.float32)
        l_sc[...] = jnp.zeros(l_sc.shape, jnp.float32)
        s_sc[...] = jnp.zeros(s_sc.shape, jnp.float32)
        c_sc[...] = jnp.zeros(c_sc.shape, jnp.float32)

    # logits tile: (B, tile_l) = xs (B, D) @ em_tile (tile_l, D)^T
    # xs is L2-normalized and pre-scaled by 1/beta; both operands are in em's
    # storage dtype and go straight to the MXU with f32 accumulation.
    logits = lax.dot_general(
        xs_ref[...], em_ref[...],
        (((1,), (1,)), ((), ())),
        preferred_element_type=jnp.float32)

    # Mask columns past the true bank length: covers (a) the partial last em
    # tile (garbage VMEM rows) and (b) fully clamped out-of-range tiles.
    col = tile_idx * tile_l + lax.broadcasted_iota(jnp.int32, (1, tile_l), 1)
    valid = col < l_total                                        # (1, tile_l)
    logits = jnp.where(valid, logits, jnp.float32(NEG_BIG))

    # smooth_rerank_label: eq[i, j] = (labels[idx[i]] == labels[j]) & valid
    start = pl.multiple_of(tile_idx * tile_l, 128)
    lab = lab_ref[:, pl.ds(start, tile_l)]                       # (1, tile_l)
    eq = ((blab_ref[...] == lab) & valid).astype(jnp.float32)    # (B, tile_l)

    # online log-sum-exp
    m_prev = m_sc[...]                                           # (B, 1)
    m_new = jnp.maximum(m_prev, jnp.max(logits, axis=1, keepdims=True))
    l_sc[...] = jnp.exp(m_prev - m_new) * l_sc[...] + jnp.sum(
        jnp.exp(logits - m_new), axis=1, keepdims=True)
    m_sc[...] = m_new

    # accumulate target·logits (un-normalized) and match counts
    s_sc[...] = s_sc[...] + jnp.sum(eq * logits, axis=1, keepdims=True)
    c_sc[...] = c_sc[...] + jnp.sum(eq, axis=1, keepdims=True)

    @pl.when(k == tiles_per_split - 1)
    def _():
        # fused partial result for this split: columns = (m, l, s, c)
        out_ref[0, :, 0:1] = m_sc[...]
        out_ref[0, :, 1:2] = l_sc[...]
        out_ref[0, :, 2:3] = s_sc[...]
        out_ref[0, :, 3:4] = c_sc[...]


def queue_loss(x, em, labels, idx, *, beta=BETA, tile_l=4096, num_splits=None):
    """Pallas implementation of QueueLoss.forward(x, idx)."""
    B, D = x.shape
    L, D2 = em.shape
    assert D == D2
    assert tile_l % 128 == 0

    if num_splits is None:
        num_splits = _default_num_splits()

    # ---- tiny wrapper-side prep (XLA) -----------------------------------
    xf = x.astype(jnp.float32)
    xn = xf / jnp.maximum(jnp.linalg.norm(xf, axis=1, keepdims=True), EPS)
    xs = (xn * (1.0 / beta)).astype(em.dtype)      # fold normalize + 1/beta

    labels = labels.astype(jnp.int32)
    batch_label = labels[idx].reshape(B, 1)        # (B, 1)

    # grid over the UN-padded bank; never create a fully-empty split
    total_tiles = _cdiv(L, tile_l)
    num_splits = max(1, min(int(num_splits), total_tiles))
    while num_splits > 1 and (num_splits - 1) * _cdiv(total_tiles, num_splits) >= total_tiles:
        num_splits -= 1
    tiles_per_split = _cdiv(total_tiles, num_splits)
    covered_tiles = num_splits * tiles_per_split

    # pad ONLY the tiny labels array (4 B/entry); padded cols are masked anyway
    Lp = covered_tiles * tile_l
    labels_row = jnp.pad(labels, (0, Lp - L), constant_values=-1).reshape(1, Lp)

    if covered_tiles == total_tiles:
        em_index_map = lambda c, k: (c * tiles_per_split + k, 0)
    else:
        # clamp out-of-range tiles onto the last real tile (re-read, no DMA);
        # their columns are fully masked in-kernel via `col < L`.
        last = total_tiles - 1
        em_index_map = lambda c, k: (jnp.minimum(c * tiles_per_split + k, last), 0)

    kernel = functools.partial(_queue_loss_kernel, tile_l=tile_l,
                               tiles_per_split=tiles_per_split, l_total=L)

    # VMEM budget (no double counting): em tile double-buffered is the only
    # big consumer; residents (xs, labels, batch labels, output, scratch) are
    # small.  Keep >= 32 MiB (v5e scoped default is only 16 MiB) and <= 44 MiB
    # (v7x has 64 MiB physical VMEM).
    em_is = jnp.dtype(em.dtype).itemsize
    xs_is = jnp.dtype(xs.dtype).itemsize
    est = (2 * tile_l * D * em_is            # em tile, double-buffered
           + 2 * B * D * xs_is               # xs (resident)
           + 2 * 8 * Lp * 4                  # (1, Lp) labels, sublane-padded
           + 2 * 8 * 128 * 4                 # batch labels
           + 2 * num_splits * B * 4 * 4      # fused partial output
           + 4 * 8 * 128 * 4)                # scratch accumulators
    vmem_limit = int(min(44 << 20, max(est + (8 << 20), 32 << 20)))

    parts = pl.pallas_call(
        kernel,
        out_shape=jax.ShapeDtypeStruct((num_splits, B, 4), jnp.float32),
        grid_spec=pltpu.PrefetchScalarGridSpec(
            num_scalar_prefetch=0,
            grid=(num_splits, tiles_per_split),
            in_specs=[
                pl.BlockSpec((B, D), lambda c, k: (0, 0)),       # xs (resident)
                pl.BlockSpec((tile_l, D), em_index_map),         # em tile (streamed)
                pl.BlockSpec((B, 1), lambda c, k: (0, 0)),       # batch labels
                pl.BlockSpec((1, Lp), lambda c, k: (0, 0)),      # bank labels (resident)
            ],
            out_specs=pl.BlockSpec((1, B, 4), lambda c, k: (c, 0, 0)),
            scratch_shapes=[pltpu.VMEM((B, 1), jnp.float32)] * 4,
        ),
        compiler_params=pltpu.CompilerParams(
            dimension_semantics=("parallel", "arbitrary"),
            vmem_limit_bytes=vmem_limit),
    )(xs, em, batch_label, labels_row)

    # ---- tiny cross-split merge (XLA) ------------------------------------
    m_p = parts[:, :, 0:1]
    l_p = parts[:, :, 1:2]
    s_p = parts[:, :, 2:3]
    c_p = parts[:, :, 3:4]
    m = jnp.max(m_p, axis=0)                               # (B, 1)
    l = jnp.sum(jnp.exp(m_p - m) * l_p, axis=0)            # (B, 1)
    lse = m + jnp.log(l)                                   # per-row log-sum-exp
    s = jnp.sum(s_p, axis=0)
    cnt = jnp.sum(c_p, axis=0)
    denom = jnp.maximum(cnt, EPS)                          # F.normalize(target, 1)
    # loss_i = -sum_j t_ij*(logits_ij - lse_i),  sum_j t_ij = cnt_i / denom_i
    loss_i = (-s + lse * cnt) / denom
    return jnp.mean(loss_i)


def queue_loss_reference(x, em, labels, idx, *, beta=BETA):
    """Plain-JAX reference mirroring the PyTorch forward (features cast to
    em.dtype before the logits matmul, matching the kernel's precision path)."""
    xf = x.astype(jnp.float32)
    xn = xf / jnp.maximum(jnp.linalg.norm(xf, axis=1, keepdims=True), EPS)
    xs = (xn * (1.0 / beta)).astype(em.dtype).astype(jnp.float32)
    emf = em.astype(jnp.float32)
    logits = jnp.dot(xs, emf.T, precision=lax.Precision.HIGHEST)
    batch_label = labels[idx]
    target = (batch_label[:, None] == labels[None, :]).astype(jnp.float32)
    target = target / jnp.maximum(jnp.sum(target, axis=1, keepdims=True), EPS)
    logp = jax.nn.log_softmax(logits, axis=1)
    return -(logp * target).sum(axis=1).mean()


if __name__ == "__main__":
    B, D = 8, 512
    key = jax.random.PRNGKey(0)
    kx, kem1, kem2, kidx1, kidx2 = jax.random.split(key, 5)
    x = jax.random.normal(kx, (B, D), dtype=jnp.float32)

    # Case 1: bf16 bank (bandwidth-optimal path), L NOT a multiple of the tile
    # -> exercises the partial last em tile, a clamped out-of-range tile and
    # the 2-split log-sum-exp merge.  (Real module: L=32621, tile_l=4096.)
    L1 = 3000
    em1 = jax.random.uniform(kem1, (L1, D), dtype=jnp.float32).astype(jnp.bfloat16)
    labels1 = jnp.arange(L1, dtype=jnp.int32)              # torch.arange(0, len)
    idx1 = jax.random.randint(kidx1, (B,), 0, L1, dtype=jnp.int32)

    loss1 = queue_loss(x, em1, labels1, idx1, tile_l=1024, num_splits=2)
    jax.block_until_ready(loss1)
    ref1 = queue_loss_reference(x, em1, labels1, idx1)
    assert jnp.allclose(loss1, ref1, rtol=2e-3, atol=2e-3), (loss1, ref1)

    # Case 2: f32 bank (matches the PyTorch module's em dtype exactly),
    # evenly tiled, repeated cluster labels (multi-match smoothed targets),
    # single split.
    L2 = 2048
    em2 = jax.random.uniform(kem2, (L2, D), dtype=jnp.float32)
    labels2 = jnp.arange(L2, dtype=jnp.int32) % 700
    idx2 = jax.random.randint(kidx2, (B,), 0, L2, dtype=jnp.int32)

    loss2 = queue_loss(x, em2, labels2, idx2, tile_l=1024, num_splits=1)
    jax.block_until_ready(loss2)
    ref2 = queue_loss_reference(x, em2, labels2, idx2)
    assert jnp.allclose(loss2, ref2, rtol=2e-3, atol=2e-3), (loss2, ref2)

    print("KERNEL_OK")
</pallas_src>

<mosaic_0001>
module attributes {stable_mosaic.version = 11 : i64} {
  func.func @_queue_loss_kernel(%arg0: i32, %arg1: i32, %arg2: memref<8x512xbf16, #tpu.memory_space<vmem>>, %arg3: memref<1024x512xbf16, #tpu.memory_space<vmem>>, %arg4: memref<8x1xi32, #tpu.memory_space<vmem>>, %arg5: memref<1x4096xi32, #tpu.memory_space<vmem>>, %arg6: memref<1x8x4xf32, #tpu.memory_space<vmem>>, %arg7: memref<8x1xf32, #tpu.memory_space<vmem>>, %arg8: memref<8x1xf32, #tpu.memory_space<vmem>>, %arg9: memref<8x1xf32, #tpu.memory_space<vmem>>, %arg10: memref<8x1xf32, #tpu.memory_space<vmem>>) attributes {dimension_semantics = [#tpu.dimension_semantics<parallel>, #tpu.dimension_semantics<arbitrary>], iteration_bounds = array<i64: 2, 2>, scalar_prefetch = 0 : i64, scratch_operands = 4 : i64, tpu.core_type = #tpu.core_type<tc>, window_params = [{pipeline_mode = #tpu.pipeline_mode<synchronous>, transform_indices = @transform_0, window_bounds = array<i64: 8, 512>}, {transform_indices = @transform_1, window_bounds = array<i64: 1024, 512>}, {pipeline_mode = #tpu.pipeline_mode<synchronous>, transform_indices = @transform_2, window_bounds = array<i64: 8, 1>}, {pipeline_mode = #tpu.pipeline_mode<synchronous>, transform_indices = @transform_3, window_bounds = array<i64: 1, 4096>}, {transform_indices = @transform_4, window_bounds = array<i64: 1, 8, 4>}]} {
    %c2_i32 = arith.constant 2 : i32
    %0 = arith.muli %arg0, %c2_i32 : i32
    %1 = arith.addi %0, %arg1 : i32
    %c0_i32 = arith.constant 0 : i32
    %2 = arith.cmpi eq, %arg1, %c0_i32 : i32
    %3 = arith.extui %2 : i1 to i32
    %c0_i32_0 = arith.constant 0 : i32
    %4 = arith.cmpi ne, %3, %c0_i32_0 : i32
    scf.if %4 {
      %cst_30 = arith.constant 0xFF800000 : f32
      %60 = vector.broadcast %cst_30 : f32 to vector<8x1xf32>
      %c0_31 = arith.constant 0 : index
      %c0_32 = arith.constant 0 : index
      %61 = vector.load %arg7[%c0_31, %c0_32] : memref<8x1xf32, #tpu.memory_space<vmem>>, vector<8x1xf32>
      tpu.vector_store %arg7[%c0_31, %c0_32], %60 {strides = array<i32>} : memref<8x1xf32, #tpu.memory_space<vmem>>, vector<8x1xf32>,
      %cst_33 = arith.constant 0.000000e+00 : f32
      %62 = vector.broadcast %cst_33 : f32 to vector<8x1xf32>
      %c0_34 = arith.constant 0 : index
      %c0_35 = arith.constant 0 : index
      %63 = vector.load %arg8[%c0_34, %c0_35] : memref<8x1xf32, #tpu.memory_space<vmem>>, vector<8x1xf32>
      tpu.vector_store %arg8[%c0_34, %c0_35], %62 {strides = array<i32>} : memref<8x1xf32, #tpu.memory_space<vmem>>, vector<8x1xf32>,
      %cst_36 = arith.constant 0.000000e+00 : f32
      %64 = vector.broadcast %cst_36 : f32 to vector<8x1xf32>
      %c0_37 = arith.constant 0 : index
      %c0_38 = arith.constant 0 : index
      %65 = vector.load %arg9[%c0_37, %c0_38] : memref<8x1xf32, #tpu.memory_space<vmem>>, vector<8x1xf32>
      tpu.vector_store %arg9[%c0_37, %c0_38], %64 {strides = array<i32>} : memref<8x1xf32, #tpu.memory_space<vmem>>, vector<8x1xf32>,
      %cst_39 = arith.constant 0.000000e+00 : f32
      %66 = vector.broadcast %cst_39 : f32 to vector<8x1xf32>
      %c0_40 = arith.constant 0 : index
      %c0_41 = arith.constant 0 : index
      %67 = vector.load %arg10[%c0_40, %c0_41] : memref<8x1xf32, #tpu.memory_space<vmem>>, vector<8x1xf32>
      tpu.vector_store %arg10[%c0_40, %c0_41], %66 {strides = array<i32>} : memref<8x1xf32, #tpu.memory_space<vmem>>, vector<8x1xf32>,
    } else {
    }
    %c0 = arith.constant 0 : index
    %c0_1 = arith.constant 0 : index
    %5 = vector.load %arg2[%c0, %c0_1] : memref<8x512xbf16, #tpu.memory_space<vmem>>, vector<8x512xbf16>
    %c0_2 = arith.constant 0 : index
    %c0_3 = arith.constant 0 : index
    %6 = vector.load %arg3[%c0_2, %c0_3] : memref<1024x512xbf16, #tpu.memory_space<vmem>>, vector<1024x512xbf16>
    %cst = arith.constant dense<0.000000e+00> : vector<8x1024xf32>
    %7 = tpu.matmul %5, %6, %cst {dimension_numbers = #tpu.dot_dimension_numbers<[1], [1], [0], [0], [0, 0, 1, 0], [], []>} : vector<8x512xbf16>, vector<1024x512xbf16>, vector<8x1024xf32> -> vector<8x1024xf32>
    %c1024_i32 = arith.constant 1024 : i32
    %8 = arith.muli %1, %c1024_i32 : i32
    %9 = tpu.iota {dimensions = array<i32: 1>} : vector<1x1024xi32>
    %10 = vector.broadcast %8 : i32 to vector<1x1024xi32>
    %11 = arith.addi %10, %9 : vector<1x1024xi32>
    %c3000_i32 = arith.constant 3000 : i32
    %12 = vector.broadcast %c3000_i32 : i32 to vector<1x1024xi32>
    %13 = arith.cmpi slt, %11, %12 : vector<1x1024xi32>
    %cst_4 = arith.constant -1.000000e+30 : f32
    %14 = vector.shape_cast %13 : vector<1x1024xi1> to vector<1x1024xi1>
    %15 = vector.broadcast %14 : vector<1x1024xi1> to vector<8x1024xi1>
    %16 = vector.broadcast %cst_4 : f32 to vector<8x1024xf32>
    %17 = arith.select %15, %7, %16 : vector<8x1024xi1>, vector<8x1024xf32>
    %c1024_i32_5 = arith.constant 1024 : i32
    %18 = arith.muli %1, %c1024_i32_5 : i32
    %19 = tpu.assume_multiple %18, 128 : i32
    %c0_6 = arith.constant 0 : index
    %20 = arith.index_cast %19 : i32 to index
    %21 = vector.load %arg5[%c0_6, %20] : memref<1x4096xi32, #tpu.memory_space<vmem>>, vector<1x1024xi32>
    %c0_7 = arith.constant 0 : index
    %c0_8 = arith.constant 0 : index
    %22 = vector.load %arg4[%c0_7, %c0_8] : memref<8x1xi32, #tpu.memory_space<vmem>>, vector<8x1xi32>
    %23 = vector.broadcast %22 : vector<8x1xi32> to vector<8x1024xi32>
    %24 = vector.broadcast %21 : vector<1x1024xi32> to vector<8x1024xi32>
    %25 = arith.cmpi eq, %23, %24 : vector<8x1024xi32>
    %26 = vector.broadcast %13 : vector<1x1024xi1> to vector<8x1024xi1>
    %27 = arith.andi %25, %26 : vector<8x1024xi1>
    %28 = arith.extui %27 : vector<8x1024xi1> to vector<8x1024xi32>
    %29 = arith.sitofp %28 : vector<8x1024xi32> to vector<8x1024xf32>
    %c0_9 = arith.constant 0 : index
    %c0_10 = arith.constant 0 : index
    %30 = vector.load %arg7[%c0_9, %c0_10] : memref<8x1xf32, #tpu.memory_space<vmem>>, vector<8x1xf32>
    %cst_11 = arith.constant dense<0xFF800000> : vector<8xf32>
    %31 = vector.multi_reduction <maximumf>, %17, %cst_11 [1] : vector<8x1024xf32> to vector<8xf32>
    %32 = vector.shape_cast %31 : vector<8xf32> to vector<8x1xf32>
    %33 = arith.maximumf %30, %32 : vector<8x1xf32>
    %34 = arith.subf %30, %33 : vector<8x1xf32>
    %35 = math.exp %34 : vector<8x1xf32>
    %c0_12 = arith.constant 0 : index
    %c0_13 = arith.constant 0 : index
    %36 = vector.load %arg8[%c0_12, %c0_13] : memref<8x1xf32, #tpu.memory_space<vmem>>, vector<8x1xf32>
    %37 = arith.mulf %35, %36 : vector<8x1xf32>
    %38 = vector.broadcast %33 : vector<8x1xf32> to vector<8x1024xf32>
    %39 = arith.subf %17, %38 : vector<8x1024xf32>
    %40 = math.exp %39 : vector<8x1024xf32>
    %cst_14 = arith.constant dense<0.000000e+00> : vector<8xf32>
    %41 = vector.multi_reduction <add>, %40, %cst_14 [1] : vector<8x1024xf32> to vector<8xf32>
    %42 = vector.shape_cast %41 : vector<8xf32> to vector<8x1xf32>
    %43 = arith.addf %37, %42 : vector<8x1xf32>
    %c0_15 = arith.constant 0 : index
    %c0_16 = arith.constant 0 : index
    %44 = vector.load %arg8[%c0_15, %c0_16] : memref<8x1xf32, #tpu.memory_space<vmem>>, vector<8x1xf32>
    tpu.vector_store %arg8[%c0_15, %c0_16], %43 {strides = array<i32>} : memref<8x1xf32, #tpu.memory_space<vmem>>, vector<8x1xf32>,
    %c0_17 = arith.constant 0 : index
    %c0_18 = arith.constant 0 : index
    %45 = vector.load %arg7[%c0_17, %c0_18] : memref<8x1xf32, #tpu.memory_space<vmem>>, vector<8x1xf32>
    tpu.vector_store %arg7[%c0_17, %c0_18], %33 {strides = array<i32>} : memref<8x1xf32, #tpu.memory_space<vmem>>, vector<8x1xf32>,
    %c0_19 = arith.constant 0 : index
    %c0_20 = arith.constant 0 : index
    %46 = vector.load %arg9[%c0_19, %c0_20] : memref<8x1xf32, #tpu.memory_space<vmem>>, vector<8x1xf32>
    %47 = arith.mulf %29, %17 : vector<8x1024xf32>
    %cst_21 = arith.constant dense<0.000000e+00> : vector<8xf32>
    %48 = vector.multi_reduction <add>, %47, %cst_21 [1] : vector<8x1024xf32> to vector<8xf32>
    %49 = vector.shape_cast %48 : vector<8xf32> to vector<8x1xf32>
    %50 = arith.addf %46, %49 : vector<8x1xf32>
    %c0_22 = arith.constant 0 : index
    %c0_23 = arith.constant 0 : index
    %51 = vector.load %arg9[%c0_22, %c0_23] : memref<8x1xf32, #tpu.memory_space<vmem>>, vector<8x1xf32>
    tpu.vector_store %arg9[%c0_22, %c0_23], %50 {strides = array<i32>} : memref<8x1xf32, #tpu.memory_space<vmem>>, vector<8x1xf32>,
    %c0_24 = arith.constant 0 : index
    %c0_25 = arith.constant 0 : index
    %52 = vector.load %arg10[%c0_24, %c0_25] : memref<8x1xf32, #tpu.memory_space<vmem>>, vector<8x1xf32>
    %cst_26 = arith.constant dense<0.000000e+00> : vector<8xf32>
    %53 = vector.multi_reduction <add>, %29, %cst_26 [1] : vector<8x1024xf32> to vector<8xf32>
    %54 = vector.shape_cast %53 : vector<8xf32> to vector<8x1xf32>
    %55 = arith.addf %52, %54 : vector<8x1xf32>
    %c0_27 = arith.constant 0 : index
    %c0_28 = arith.constant 0 : index
    %56 = vector.load %arg10[%c0_27, %c0_28] : memref<8x1xf32, #tpu.memory_space<vmem>>, vector<8x1xf32>
    tpu.vector_store %arg10[%c0_27, %c0_28], %55 {strides = array<i32>} : memref<8x1xf32, #tpu.memory_space<vmem>>, vector<8x1xf32>,
    %c1_i32 = arith.constant 1 : i32
    %57 = arith.cmpi eq, %arg1, %c1_i32 : i32
    %58 = arith.extui %57 : i1 to i32
    %c0_i32_29 = arith.constant 0 : i32
    %59 = arith.cmpi ne, %58, %c0_i32_29 : i32
    scf.if %59 {
      %c0_30 = arith.constant 0 : index
      %c0_31 = arith.constant 0 : index
      %60 = vector.load %arg7[%c0_30, %c0_31] : memref<8x1xf32, #tpu.memory_space<vmem>>, vector<8x1xf32>
      %c0_32 = arith.constant 0 : index
      %c0_33 = arith.constant 0 : index
      %c0_34 = arith.constant 0 : index
      %61 = vector.load %arg6[%c0_32, %c0_33, %c0_34] : memref<1x8x4xf32, #tpu.memory_space<vmem>>, vector<1x8x1xf32>
      %62 = vector.shape_cast %61 : vector<1x8x1xf32> to vector<8x1xf32>
      %63 = vector.shape_cast %60 : vector<8x1xf32> to vector<1x8x1xf32>
      tpu.vector_store %arg6[%c0_32, %c0_33, %c0_34], %63 {strides = array<i32>} : memref<1x8x4xf32, #tpu.memory_space<vmem>>, vector<1x8x1xf32>,
      %c0_35 = arith.constant 0 : index
      %c0_36 = arith.constant 0 : index
      %64 = vector.load %arg8[%c0_35, %c0_36] : memref<8x1xf32, #tpu.memory_space<vmem>>, vector<8x1xf32>
      %c0_37 = arith.constant 0 : index
      %c0_38 = arith.constant 0 : index
      %c1 = arith.constant 1 : index
      %65 = vector.load %arg6[%c0_37, %c0_38, %c1] : memref<1x8x4xf32, #tpu.memory_space<vmem>>, vector<1x8x1xf32>
      %66 = vector.shape_cast %65 : vector<1x8x1xf32> to vector<8x1xf32>
      %67 = vector.shape_cast %64 : vector<8x1xf32> to vector<1x8x1xf32>
      tpu.vector_store %arg6[%c0_37, %c0_38, %c1], %67 {strides = array<i32>} : memref<1x8x4xf32, #tpu.memory_space<vmem>>, vector<1x8x1xf32>,
      %c0_39 = arith.constant 0 : index
      %c0_40 = arith.constant 0 : index
      %68 = vector.load %arg9[%c0_39, %c0_40] : memref<8x1xf32, #tpu.memory_space<vmem>>, vector<8x1xf32>
      %c0_41 = arith.constant 0 : index
      %c0_42 = arith.constant 0 : index
      %c2 = arith.constant 2 : index
      %69 = vector.load %arg6[%c0_41, %c0_42, %c2] : memref<1x8x4xf32, #tpu.memory_space<vmem>>, vector<1x8x1xf32>
      %70 = vector.shape_cast %69 : vector<1x8x1xf32> to vector<8x1xf32>
      %71 = vector.shape_cast %68 : vector<8x1xf32> to vector<1x8x1xf32>
      tpu.vector_store %arg6[%c0_41, %c0_42, %c2], %71 {strides = array<i32>} : memref<1x8x4xf32, #tpu.memory_space<vmem>>, vector<1x8x1xf32>,
      %c0_43 = arith.constant 0 : index
      %c0_44 = arith.constant 0 : index
      %72 = vector.load %arg10[%c0_43, %c0_44] : memref<8x1xf32, #tpu.memory_space<vmem>>, vector<8x1xf32>
      %c0_45 = arith.constant 0 : index
      %c0_46 = arith.constant 0 : index
      %c3 = arith.constant 3 : index
      %73 = vector.load %arg6[%c0_45, %c0_46, %c3] : memref<1x8x4xf32, #tpu.memory_space<vmem>>, vector<1x8x1xf32>
      %74 = vector.shape_cast %73 : vector<1x8x1xf32> to vector<8x1xf32>
      %75 = vector.shape_cast %72 : vector<8x1xf32> to vector<1x8x1xf32>
      tpu.vector_store %arg6[%c0_45, %c0_46, %c3], %75 {strides = array<i32>} : memref<1x8x4xf32, #tpu.memory_space<vmem>>, vector<1x8x1xf32>,
    } else {
    }
    return
  }
  func.func @transform_0(%arg0: i32, %arg1: i32) -> (i32, i32) {
    %c0_i32 = arith.constant 0 : i32
    %c0_i32_0 = arith.constant 0 : i32
    %c0_i32_1 = arith.constant 0 : i32
    return %c0_i32, %c0_i32_0 : i32, i32
  }
  func.func @transform_1(%arg0: i32, %arg1: i32) -> (i32, i32) {
    %c2_i32 = arith.constant 2 : i32
    %0 = arith.muli %arg0, %c2_i32 : i32
    %1 = arith.addi %0, %arg1 : i32
    %c2_i32_0 = arith.constant 2 : i32
    %2 = arith.minsi %1, %c2_i32_0 : i32
    %c0_i32 = arith.constant 0 : i32
    %c0_i32_1 = arith.constant 0 : i32
    return %2, %c0_i32 : i32, i32
  }
  func.func @transform_2(%arg0: i32, %arg1: i32) -> (i32, i32) {
    %c0_i32 = arith.constant 0 : i32
    %c0_i32_0 = arith.constant 0 : i32
    %c0_i32_1 = arith.constant 0 : i32
    return %c0_i32, %c0_i32_0 : i32, i32
  }
  func.func @transform_3(%arg0: i32, %arg1: i32) -> (i32, i32) {
    %c0_i32 = arith.constant 0 : i32
    %c0_i32_0 = arith.constant 0 : i32
    %c0_i32_1 = arith.constant 0 : i32
    return %c0_i32, %c0_i32_0 : i32, i32
  }
  func.func @transform_4(%arg0: i32, %arg1: i32) -> (i32, i32, i32) {
    %c0_i32 = arith.constant 0 : i32
    %c0_i32_0 = arith.constant 0 : i32
    %c0_i32_1 = arith.constant 0 : i32
    return %arg0, %c0_i32, %c0_i32_0 : i32, i32, i32
  }
}

</mosaic_0001>

<bundles_post_ra>
// kernel: tpu_custom_call.1
= control target key start
LH: loop header
LB: loop body
LE: loop exit
PB: predicated region body
PF: predicated region fallthrough
CT: control target
= control target key end

     0   :  { %9 = vsyncpa [#allocation7], 0  ;;  %s4156_s0 = inlined_call_operand.hbm [shape: bf16[8,512], index: 0, kind: input, shape index: {}]   ;;  %s4157_s1 = inlined_call_operand.hbm [shape: bf16[3000,512], index: 1, kind: input, shape index: {}]   ;;  %s4158_s2 = inlined_call_operand.vmem [shape: s32[8,1], index: 2, kind: input, shape index: {}]   ;;  %s4159_s3 = inlined_call_operand.hbm [shape: s32[1,4096], index: 3, kind: input, shape index: {}]   ;;  %s4160_s4 = inlined_call_operand.vmem [shape: f32[2,8,4], index: 4, kind: output, shape index: {}]  }
   0x1   :  { %10 = vsyncpa [#allocation9], 0 }
   0x2   :  { %12 = vsyncpa [#allocation9 + $0x1], 0  ;;  %s3506_s15 = smov 0   ;;  %s3508_s16 = smov 0  }
   0x3   :  { %s3510_s17 = smov 0   ;;  %s3512_s18 = smov 0  }
   0x4   :  { %s3514_s19 = smov 0   ;;  %s3516_s20 = smov 0  }
   0x5   :  { %s3518_s21 = smov 0   ;;  %s3520_s22 = smov 0  }
   0x6 LB: > { %s4165_s23 = sadd.s32 4294967295, %s3467_s22   ;;  %s27_s24 = sadd.s32 1, %s3459_s20  ;;  %s3467_s22 = sphi %s3520_s22, %s18_s22   ;;  %s3463_s21 = sphi %s3518_s21, %s4182_s21   ;;  %s3459_s20 = sphi %s3516_s20, %s4181_s20   ;;  %s3455_s19 = sphi %s3514_s19, %s4180_s19   ;;  %s3451_s18 = sphi %s3512_s18, %s4179_s18   ;;  %s3447_s17 = sphi %s3510_s17, %s4178_s17   ;;  %s3443_s16 = sphi %s3508_s16, %s4177_s16   ;;  %s3439_s15 = sphi %s3506_s15, %s4176_s15  }
   0x7   : > { %p28_p0 = scmp.ge.s32.totalorder %s27_s24, 2  ;;  %s30_s25 = sadd.s32 1, %s3463_s21 }
   0x8   : > { %s2514_s26 = sshll.u32 %s3463_s21, 1  ;;  %s66_s27 = sadd.s32 1, %s3447_s17 }
   0x9   : > { %s4184_s24 = smov (%p28_p0, %s27_s24), 0  ;;  %s4186_s25 = smov (!%p28_p0, %s30_s25), %s3463_s21 }
   0xa   : > { %s56_s28 = sadd.s32 %s3459_s20, %s2514_s26  ;;  %p73_p1 = scmp.ne.s32.totalorder %s3447_s17, %s3443_s16 }
   0xb   : > { %p32_p2 = scmp.ge.s32.totalorder %s4186_s25, 2  ;;  %p57_p3 = scmp.lt.s32.totalorder %s56_s28, 2 }
   0xc   : > { %p74_p4 = scmp.eq.s32.totalorder %s3467_s22, 0  ;;  %p79_p5 = scmp.ne.s32.totalorder %s3443_s16, %s3439_s15 }
   0xd   : > { %s4188_s25 = smov (%p32_p2, %s4186_s25), 0  ;;  %s4190_s28 = smov (!%p57_p3, %s56_s28), 2 }
   0xe   : > { %s2515_s29 = sshll.u32 %s4188_s25, 1  ;;  %p3565_p6 = por %p74_p4, %p73_p1 }
   0xf   : > { %s60_s5 = sadd.s32 %s2515_s29, %s4184_s24  ;;  %p3572_p7 = scmp.eq.s32.totalorder %s4165_s23, 0 }
  0x10   : > { %s4166_s30 = scalar_select %p3565_p6, 1, 0 }
  0x11   : > { %s4167_s6 = scalar_select %p3572_p7, 1, 0 }
  0x12   : > { %p61_p8 = scmp.lt.s32.totalorder %s60_s5, 2  ;;  %p2516_p9 = scmp.ge.s32.totalorder %s3467_s22, 1 }
  0x13   : > { %p3579_p10 = por %p3572_p7, %p79_p5  ;;  %p158_p11 = scmp.lt.s32.totalorder %s3467_s22, 5 }
  0x14   : > { %s4192_s5 = smov (!%p61_p8, %s60_s5), 2  ;;  %s3469_s10 = smov [#allocation6]  }
  0x15   : > { %s4168_s7 = scalar_select %p3579_p10, 1, 0 }
  0x16   : > { %p3584_p12 = pnand %p2516_p9, %p158_p11  ;;  %s63_s9 = ssub.s32 %s4190_s28, %s4192_s5 }
  0x17   : > { %p64_p13 = scmp.eq.s32.totalorder %s63_s9, 0  ;;  %s171_s11 = sshll.u32 %s3469_s10, 4  ;;  %s172_s11 = int_to_ptr.vmem [resolvable:$true] %s171_s11 }
  0x18   : > { %s4169_s8 = scalar_select %p3584_p12, 1, 0 }
  0x19   : > { %p2821_p0 = pneg %p3584_p12  ;;  %s3470_s14 = smov [#allocation10]  }
  0x1a   : > { %s3592_s12 = scalar_select %p64_p13, %s3447_s17, %s66_s27  }
  0x1b   : > { %p3596_p1 = pnand %p2821_p0, %p3572_p7  ;;  %s185_s15 = sshll.u32 %s3470_s14, 4  ;;  %s186_s15 = int_to_ptr.vmem [resolvable:$true] %s185_s15 }
  0x1c   : > { %s3326_s26 = scalar_lea.vmem %s172_s11, 256  ;;  %p3334_p8 = scmp.lt.s32.totalorder %s172_s11, %s172_s11 }
  0x1d   : > { %p3317_p2 = pneg %p3596_p1  ;;  %p3327_p3 = scmp.ne.s32.totalorder %s172_s11, %s3326_s26 }
  0x1e   : > { %p3335_p9 = scmp.lt.s32.totalorder %s3326_s26, %s3326_s26 }
  0x1f   : > { %p3329_p4 = pnand %p3327_p3, %p3317_p2 }
  0x20   : > { %p3336_p11 = por %p3335_p9, %p3334_p8 }
  0x21   : > { %p3330_p5 = pneg %p3329_p4 }
  0x23   : > { %p3337_p13 = pnand %p3336_p11, %p3330_p5 }
  0x25   : > { %3340 = shalt.err (!%p3337_p13)
}
  0x26   : > { %2824 = dma.hbm_to_vmem [thread:$0]  (!%p3596_p1), %s4156_s0, 256, %s172_s11, [#allocation7]  }
  0x27   : > { %s3352_s5 = scalar_lea.vmem %s186_s15, 512  ;;  %p3360_p3 = scmp.lt.s32.totalorder %s186_s15, %s186_s15 }
  0x28   : > { %p3353_p0 = scmp.ne.s32.totalorder %s186_s15, %s3352_s5  ;;  %p3361_p4 = scmp.lt.s32.totalorder %s3352_s5, %s3352_s5 }
  0x2a   : > { %p3355_p10 = pnand %p3353_p0, %p3317_p2  ;;  %p3362_p12 = por %p3361_p4, %p3360_p3 }
  0x2c   : > { %p3356_p7 = pneg %p3355_p10 }
  0x2e   : > { %p3363_p6 = pnand %p3362_p12, %p3356_p7 }
  0x30   : > { %3366 = shalt.err (!%p3363_p6)
}
  0x31   : > { %2827 = dma.hbm_to_vmem [thread:$0]  (!%p3596_p1), %s4159_s3, 512, %s186_s15, [#allocation9]  }
  0x32   : > { %p2519_p5 = scmp.ge.s32.totalorder %s3467_s22, 4 }
  0x33   : > { %p4171_p8 = scmp.ne.s32.totalorder (!%p2519_p5), %s4166_s30, 0 }
  0x34   : > { %192 = sbr.rel (%p2519_p5) target bundleno = 89 (0x59), region = 28 }
  0x39   : > { %195 = sbr.rel (!%p4171_p8) target bundleno = 89 (0x59), region = 32  ;;  %s196_s11 = sand.u32 (%p4171_p8), 1, %s3467_s22  }
  0x3a   : > { %s198_s14 = sand.u32 (%p4171_p8), 1, %s3447_s17   ;;  %s2522_s27 = sshll.u32 (%p4171_p8), %s4190_s28, 7 }
  0x3b   : > { %s2520_s26 = sshll.u32 (%p4171_p8), %s198_s14, 11  ;;  %s206_s29 = ssub.s32 (%p4171_p8), 375, %s2522_s27 }
  0x3c   : > { %p207_p6 = scmp.lt.s32.totalorder (%p4171_p8), %s206_s29, 128  ;;  %s3627_s5 = scalar_lea.sflag (%p4171_p8), [#allocation9], %s196_s11 }
  0x3d   : > { %s200_s9 = scalar_lea.vmem (%p4171_p8), [#allocation8], %s2520_s26 }
  0x3e   : > { %s4194_s29 = smov (!%p207_p6, %s206_s29), 128 }
  0x3f   : > { %s3624_s13 = sshll.u32 %s4194_s29, 8 }
  0x40   : > { %s212_s15 = ssub.s32 32768, %s3624_s13 }
  0x41   : > { %213 = vsyncadd %s3627_s5, %s212_s15  ;;  %p2525_p7 = scmp.ne.s32.totalorder %s3624_s13, 0  ;;  %s2811_s30 = sshll.u32 %s4190_s28, 15 }
  0x42   : > { %s3635_s27 = scalar_lea.hbm %s4157_s1, %s2811_s30  ;;  %s219_s29 = sshll.u32 %s200_s9, 4  ;;  %s3637_s29 = int_to_ptr.vmem [resolvable:$true] %s219_s29 }
  0x43   : > { %s3367_s11 = scalar_lea.hbm %s3635_s27, %s3624_s13  ;;  %s3371_s23 = scalar_lea.hbm %s4157_s1, 96000 }
  0x44   : > { %p3368_p10 = scmp.ne.s32.totalorder %s3635_s27, %s3367_s11  ;;  %p3373_p2 = scmp.lt.s32.totalorder %s3371_s23, %s3367_s11 }
  0x46   : > { %p3369_p12 = pnand %p3368_p10, %p2525_p7 }
  0x48   : > { %p3370_p1 = pneg %p3369_p12 }
  0x4a   : > { %p3375_p9 = pnand %p3373_p2, %p3370_p1 }
  0x4c   : > { %3378 = shalt.err (!%p3375_p9)
}
  0x4d   : > { %s3379_s28 = scalar_lea.vmem %s3637_s29, %s3624_s13  ;;  %s3471_s9 = smov [#allocation8]  }
  0x4e   : > { %p3380_p11 = scmp.ne.s32.totalorder %s3637_s29, %s3379_s28  ;;  %s3383_s30 = sshll.u32 %s3471_s9, 4  ;;  %s3384_s30 = int_to_ptr.vmem [resolvable:$false] %s3383_s30 }
  0x4f   : > { %s3385_s10 = scalar_lea.vmem %s3384_s30, 65536  ;;  %p3386_p3 = scmp.lt.s32.totalorder %s3637_s29, %s3384_s30 }
  0x50   : > { %p3381_p13 = pnand %p3380_p11, %p2525_p7  ;;  %p3387_p4 = scmp.lt.s32.totalorder %s3385_s10, %s3379_s28 }
  0x52   : > { %p3382_p0 = pneg %p3381_p13  ;;  %p3388_p5 = por %p3387_p4, %p3386_p3 }
  0x54   : > { %p3389_p8 = pnand %p3388_p5, %p3382_p0 }
  0x56   : > { %3392 = shalt.err (!%p3389_p8)
}
  0x57   : > { %s3472_s23 = smov 256   ;;  %s3473_s14 = smov 16  }
  0x58   : > { %225 = dma.hbm_to_vmem [thread:$0]  (%p2525_p7), %s3635_s27, %s3624_s13, %s3637_s29, %s3627_s5, %s3472_s23, %s3472_s23, %s3473_s14  }
  0x59 PF: > { %p4172_p6 = scmp.ne.s32.totalorder %s4169_s8, 0 }
  0x5a   : > { %p4173_p10 = scmp.ne.s32.totalorder (!%p4172_p6), %s4167_s6, 0 }
  0x5b   : > { %231 = sbr.rel (%p4172_p6) target bundleno = 1399 (0x577), region = 36 }
  0x60   : > { %3426 = dma.done.wait (%p4173_p10), [#allocation7], 256  }
  0x61   : > { %3428 = vsyncadd (%p4173_p10), [#allocation7], 4294967040  ;;  %s4174_s11 = sadd.s32 4294967295, %s3467_s22   ;;  %s239_s15 = sand.u32 1, %s3443_s16  }
  0x62   : > { %s237_s26 = sand.u32 1, %s4174_s11   ;;  %s2532_s28 = sshll.u32 %s239_s15, 11 }
  0x63   : > { %s238_s9 = scalar_lea.sflag [#allocation9], %s237_s26  ;;  %s3668_s13 = scalar_lea.vmem [#allocation8], %s2532_s28 }
  0x64   : > { %p4175_p7 = scmp.ne.s32.totalorder %s4168_s7, 0 }
  0x66   : > { %3430 = dma.done.wait (%p4175_p7), %s238_s9, 32768  }
  0x67   : > { %3432 = vsyncadd (%p4175_p7), %s238_s9, 4294934528 }
  0x68   : > { %3434 = dma.done.wait (%p4173_p10), [#allocation9], 512  }
  0x69   : > { %3436 = vsyncadd (%p4173_p10), [#allocation9], 4294966784  ;;  %p279_p12 = scmp.lt.s32.totalorder %s3455_s19, 1  ;;  %s2535_s8 = sshll.u32 %s3455_s19, 1 }
  0x6a   : > { %s3681_s5 = sadd.s32 %s3451_s18, %s2535_s8  ;;  %p2536_p1 = scmp.ne.s32.totalorder %s3451_s18, 0 }
  0x6b   : > { %s4196_s19 = smov (!%p279_p12, %s3455_s19), 1 }
  0x6c   : > { %s2534_s27 = sshll.u32 %s4196_s19, 3  ;;  %288 = sbr.rel (%p2536_p1) target bundleno = 116 (0x74), region = 52 }
  0x6d   : > { %s3687_s7 = scalar_lea.vmem %s4160_s4, %s2534_s27 }
  0x71   : > { %vm289_vm0 = vcmask 7168   ;;  %v3474_v0 = vmov -inf   ;;  %v3475_v1 = vmov 0.0  }
  0x72   : > { %290 = vst.msk [vmem:[#allocation2] sm:$0xff] %vm289_vm0, %v3474_v0  ;;  %291 = vst.msk [vmem:[#allocation3] sm:$0xff] %vm289_vm0, %v3475_v1 }
  0x73   : > { %292 = vst.msk [vmem:[#allocation4] sm:$0xff] %vm289_vm0, %v3475_v1  ;;  %293 = vst.msk [vmem:[#allocation5] sm:$0xff] %vm289_vm0, %v3475_v1 }
  0x74 PF: > { %v2909_v2 = vld [vmem:[%s3668_s13 + $0xe4] ss:$16 sps:$4 sm:$0xff]   ;;  %v2911_v3 = vld [vmem:[%s3668_s13 + $0xec] ss:$16 sps:$4 sm:$0xff]   ;;  %v2913_v4 = vld [vmem:[%s3668_s13 + $0xe0] ss:$16 sps:$4 sm:$0xff]  }
  0x75   : > { %1846 = vmatprep.subr.bf16.mxu0 %v2909_v2  ;;  %v2914_v5 = vld [vmem:[%s3668_s13 + $0xe8] ss:$16 sps:$4 sm:$0xff]   ;;  %1887 = vmatprep.subr.bf16.mxu1 %v2911_v3  ;;  %v2915_v6 = vld [vmem:[%s3668_s13 + $0xc4] ss:$16 sps:$4 sm:$0xff]   ;;  %v2917_v7 = vld [vmem:[%s3668_s13 + $0xcc] ss:$16 sps:$4 sm:$0xff]  }
  0x76   : > { %1847 = vmatpush1.bf16.xpose.msra.mxu0 %v2913_v4  ;;  %1888 = vmatpush1.bf16.xpose.msra.mxu1 %v2914_v5  ;;  %v2919_v8 = vld [vmem:[%s3668_s13 + $0xc0] ss:$16 sps:$4 sm:$0xff]   ;;  %v2920_v9 = vld [vmem:[%s3668_s13 + $0xc8] ss:$16 sps:$4 sm:$0xff]   ;;  %v2921_v10 = vld [vmem:[%s3668_s13 + $0xa4] ss:$16 sps:$4 sm:$0xff]  }
  0x77   : > { %1848 = vmatprep.subr.bf16.mxu0 %v2915_v6  ;;  %1889 = vmatprep.subr.bf16.mxu1 %v2917_v7  ;;  %v2923_v11 = vld [vmem:[%s3668_s13 + $0xac] ss:$16 sps:$4 sm:$0xff]   ;;  %v2925_v12 = vld [vmem:[%s3668_s13 + $0xa0] ss:$16 sps:$4 sm:$0xff]   ;;  %v2926_v13 = vld [vmem:[%s3668_s13 + $0xa8] ss:$16 sps:$4 sm:$0xff]  }
  0x78   : > { %v2927_v14 = vld [vmem:[%s3668_s13 + $0x84] ss:$16 sps:$4 sm:$0xff]   ;;  %v2929_v15 = vld [vmem:[%s3668_s13 + $0x8c] ss:$16 sps:$4 sm:$0xff]   ;;  %v2931_v16 = vld [vmem:[%s3668_s13 + $0x80] ss:$16 sps:$4 sm:$0xff]  }
  0x79   : > { %v2932_v17 = vld [vmem:[%s3668_s13 + $0x88] ss:$16 sps:$4 sm:$0xff]   ;;  %v2933_v18 = vld [vmem:[%s3668_s13 + $0x64] ss:$16 sps:$4 sm:$0xff]   ;;  %v2935_v19 = vld [vmem:[%s3668_s13 + $0x6c] ss:$16 sps:$4 sm:$0xff]  }
  0x7a   : > { %v2937_v20 = vld [vmem:[%s3668_s13 + $0x60] ss:$16 sps:$4 sm:$0xff]   ;;  %v2938_v21 = vld [vmem:[%s3668_s13 + $0x68] ss:$16 sps:$4 sm:$0xff]   ;;  %v2939_v22 = vld [vmem:[%s3668_s13 + $0x44] ss:$16 sps:$4 sm:$0xff]  }
  0x7b   : > { %v2941_v23 = vld [vmem:[%s3668_s13 + $0x4c] ss:$16 sps:$4 sm:$0xff]   ;;  %v2943_v24 = vld [vmem:[%s3668_s13 + $0x40] ss:$16 sps:$4 sm:$0xff]   ;;  %v2944_v25 = vld [vmem:[%s3668_s13 + $0x48] ss:$16 sps:$4 sm:$0xff]  }
  0x7c   : > { %v2945_v26 = vld [vmem:[%s3668_s13 + $0x24] ss:$16 sps:$4 sm:$0xff]   ;;  %v2947_v27 = vld [vmem:[%s3668_s13 + $0x2c] ss:$16 sps:$4 sm:$0xff]   ;;  %v2949_v32 = vld [vmem:[%s3668_s13 + $0x20] ss:$16 sps:$4 sm:$0xff]  }
  0x7d   : > { %v3716_v28 = vld [vmem:[#allocation6] sm:$0xff]  ;;  %v3722_v30 = vld [vmem:[#allocation6 + $0x8] sm:$0xff]  ;;  %v3476_v47 = vmov 0   ;;  %s2797_s10 = sshll.u32 %s3681_s5, 10  ;;  %p2806_p2 = scmp.ne.s32.totalorder %s3451_s18, 1 }
  0x7e   : > { %1849 = vmatpush1.bf16.xpose.msra.mxu0 %v2919_v8  ;;  %1890 = vmatpush1.bf16.xpose.msra.mxu1 %v2920_v9  ;;  %v3720_v29 = vcombine.high %v3716_v28, %v3716_v28  ;;  %v3726_v31 = vcombine.high %v3722_v30, %v3722_v30  ;;  %v2950_v33 = vld [vmem:[%s3668_s13 + $0x28] ss:$16 sps:$4 sm:$0xff]   ;;  %v2951_v34 = vld [vmem:[%s3668_s13 + $0x4] ss:$16 sps:$4 sm:$0xff]   ;;  %v2953_v35 = vld [vmem:[%s3668_s13 + $0xc] ss:$16 sps:$4 sm:$0xff]  }
  0x7f   : > { %1850 = vmatprep.subr.bf16.mxu0 %v2921_v10  ;;  %1891 = vmatprep.subr.bf16.mxu1 %v2923_v11  ;;  %v2955_v36 = vld [vmem:[%s3668_s13] ss:$16 sps:$4 sm:$0xff]   ;;  %v2956_v37 = vld [vmem:[%s3668_s13 + $0x8] ss:$16 sps:$4 sm:$0xff]   ;;  %v2957_v38 = vld [vmem:[%s3668_s13 + $0x1e4] ss:$16 sps:$4 sm:$0xff]  }
  0x80   : > { %1878 = vmatprep.mubr.bf16.mxu0 %v3720_v29  ;;  %1919 = vmatprep.mubr.bf16.mxu1 %v3726_v31  ;;  %v2959_v39 = vld [vmem:[%s3668_s13 + $0x1ec] ss:$16 sps:$4 sm:$0xff]   ;;  %v2961_v40 = vld [vmem:[%s3668_s13 + $0x1e0] ss:$16 sps:$4 sm:$0xff]   ;;  %v2962_v41 = vld [vmem:[%s3668_s13 + $0x1e8] ss:$16 sps:$4 sm:$0xff]  }
  0x81   : > { %v2963_v42 = vld [vmem:[%s3668_s13 + $0x1c4] ss:$16 sps:$4 sm:$0xff]   ;;  %v2965_v43 = vld [vmem:[%s3668_s13 + $0x1cc] ss:$16 sps:$4 sm:$0xff]   ;;  %v2967_v45 = vld [vmem:[%s3668_s13 + $0x1c0] ss:$16 sps:$4 sm:$0xff]   ;;  %2908 = vset.pattern.permute.xlu1 %v3476_v47  ;;  %2907 = vset.pattern.permute.xlu0 %v3476_v47 }
  0x82   : > { %v2229_v44 = vld [vmem:[%s4158_s2] sm:$0xff]  ;;  %v2968_v46 = vld [vmem:[%s3668_s13 + $0x1c8] ss:$16 sps:$4 sm:$0xff]   ;;  %v2971_v49 = vld [vmem:[%s3668_s13 + $0x1ac] ss:$16 sps:$4 sm:$0xff]   ;;  %s2225_s23 = sshra.s32 %s2797_s10, 7 }
  0x83   : > { %v2969_v48 = vld [vmem:[%s3668_s13 + $0x1a4] ss:$16 sps:$4 sm:$0xff]   ;;  %2231 = vperm.xlu1 %2908, %v2229_v44   ;;  %v2973_v50 = vld [vmem:[%s3668_s13 + $0x1a0] ss:$16 sps:$4 sm:$0xff]   ;;  %v2974_v51 = vld [vmem:[%s3668_s13 + $0x1a8] ss:$16 sps:$4 sm:$0xff]  }
  0x84   : > { %v2975_v52 = vld [vmem:[%s3668_s13 + $0x184] ss:$16 sps:$4 sm:$0xff]   ;;  %v2977_v53 = vld [vmem:[%s3668_s13 + $0x18c] ss:$16 sps:$4 sm:$0xff]   ;;  %v2979_v54 = vld [vmem:[%s3668_s13 + $0x180] ss:$16 sps:$4 sm:$0xff]  }
  0x85   : > { %v2980_v55 = vld [vmem:[%s3668_s13 + $0x188] ss:$16 sps:$4 sm:$0xff]   ;;  %v2981_v56 = vld [vmem:[%s3668_s13 + $0x164] ss:$16 sps:$4 sm:$0xff]   ;;  %v2983_v57 = vld [vmem:[%s3668_s13 + $0x16c] ss:$16 sps:$4 sm:$0xff]  }
  0x86   : > { %1851 = vmatpush1.bf16.xpose.msra.mxu0 %v2925_v12  ;;  %1892 = vmatpush1.bf16.xpose.msra.mxu1 %v2926_v13  ;;  %v2985_v58 = vld [vmem:[%s3668_s13 + $0x160] ss:$16 sps:$4 sm:$0xff]   ;;  %v2986_v59 = vld [vmem:[%s3668_s13 + $0x168] ss:$16 sps:$4 sm:$0xff]   ;;  %v2987_v60 = vld [vmem:[%s3668_s13 + $0x144] ss:$16 sps:$4 sm:$0xff]   ;;  %v3777_v12 = vcombine.low %v3716_v28, %v3716_v28  ;;  %v3781_v13 = vcombine.low %v3722_v30, %v3722_v30 }
  0x87   : > { %1852 = vmatprep.subr.bf16.mxu0 %v2927_v14  ;;  %1893 = vmatprep.subr.bf16.mxu1 %v2929_v15  ;;  %v2989_v61 = vld [vmem:[%s3668_s13 + $0x14c] ss:$16 sps:$4 sm:$0xff]   ;;  %v2991_v62 = vld [vmem:[%s3668_s13 + $0x140] ss:$16 sps:$4 sm:$0xff]   ;;  %v2992_v63 = vld [vmem:[%s3668_s13 + $0x148] ss:$16 sps:$4 sm:$0xff]  }
  0x88   : > { %v2993_v0 = vld [vmem:[%s3668_s13 + $0x124] ss:$16 sps:$4 sm:$0xff]   ;;  %v2995_v1 = vld [vmem:[%s3668_s13 + $0x12c] ss:$16 sps:$4 sm:$0xff]   ;;  %v2997_v2 = vld [vmem:[%s3668_s13 + $0x120] ss:$16 sps:$4 sm:$0xff]  }
  0x89   : > { %v2998_v3 = vld [vmem:[%s3668_s13 + $0x128] ss:$16 sps:$4 sm:$0xff]   ;;  %v2999_v4 = vld [vmem:[%s3668_s13 + $0x104] ss:$16 sps:$4 sm:$0xff]   ;;  %v3001_v5 = vld [vmem:[%s3668_s13 + $0x10c] ss:$16 sps:$4 sm:$0xff]  }
  0x8a   : > { %v3003_v6 = vld [vmem:[%s3668_s13 + $0x100] ss:$16 sps:$4 sm:$0xff]   ;;  %v3004_v7 = vld [vmem:[%s3668_s13 + $0x108] ss:$16 sps:$4 sm:$0xff]   ;;  %v3011_v8 = vld [vmem:[%s3668_s13 + $0x2e4] ss:$16 sps:$4 sm:$0xff]  }
  0x8b   : > { %v3014_v9 = vld [vmem:[%s3668_s13 + $0x2ec] ss:$16 sps:$4 sm:$0xff]   ;;  %v3009_v10 = vld [vmem:[%s3668_s13 + $0x2e0] ss:$16 sps:$4 sm:$0xff]   ;;  %v3012_v11 = vld [vmem:[%s3668_s13 + $0x2e8] ss:$16 sps:$4 sm:$0xff]  }
  0x8c   : > { %v3017_v14 = vld [vmem:[%s3668_s13 + $0x2c4] ss:$16 sps:$4 sm:$0xff]   ;;  %v3020_v15 = vld [vmem:[%s3668_s13 + $0x2cc] ss:$16 sps:$4 sm:$0xff]   ;;  %v3033_v28 = vld [vmem:[%s3668_s13 + $0x260] ss:$16 sps:$4 sm:$0xff]  }
  0x8d   : > { %v3036_v30 = vld [vmem:[%s3668_s13 + $0x268] ss:$16 sps:$4 sm:$0xff]   ;;  %v3059_v44 = vld [vmem:[%s3668_s13 + $0x3e4] ss:$16 sps:$4 sm:$0xff]   ;;  %s2227_s14 = scalar_lea.vmem [#allocation10], %s2225_s23  ;;  %s3478_s11 = smov (!%p2806_p2), 1  }
  0x8e   : > { %1853 = vmatpush1.bf16.xpose.msra.mxu0 %v2931_v16  ;;  %1894 = vmatpush1.bf16.xpose.msra.mxu1 %v2932_v17  ;;  %v3015_v16 = vld [vmem:[%s3668_s13 + $0x2c0] ss:$16 sps:$4 sm:$0xff]   ;;  %v3018_v17 = vld [vmem:[%s3668_s13 + $0x2c8] ss:$16 sps:$4 sm:$0xff]   ;;  %s3479_s26 = smov (!%p2806_p2), 3   ;;  %s3480_s15 = smov (!%p2806_p2), 2  }
  0x8f   : > { %1854 = vmatprep.subr.bf16.mxu0 %v2933_v18  ;;  %1895 = vmatprep.subr.bf16.mxu1 %v2935_v19  ;;  %v3023_v18 = vld [vmem:[%s3668_s13 + $0x2a4] ss:$16 sps:$4 sm:$0xff]   ;;  %v3026_v19 = vld [vmem:[%s3668_s13 + $0x2ac] ss:$16 sps:$4 sm:$0xff]   ;;  %v3060_v47 = vld [vmem:[%s3668_s13 + $0x3e8] ss:$16 sps:$4 sm:$0xff]  }
  0x96   : > { %1855 = vmatpush1.bf16.xpose.msra.mxu0 %v2937_v20  ;;  %1896 = vmatpush1.bf16.xpose.msra.mxu1 %v2938_v21  ;;  %v3021_v20 = vld [vmem:[%s3668_s13 + $0x2a0] ss:$16 sps:$4 sm:$0xff]   ;;  %v3024_v21 = vld [vmem:[%s3668_s13 + $0x2a8] ss:$16 sps:$4 sm:$0xff]  }
  0x97   : > { %1856 = vmatprep.subr.bf16.mxu0 %v2939_v22  ;;  %1897 = vmatprep.subr.bf16.mxu1 %v2941_v23  ;;  %v3029_v22 = vld [vmem:[%s3668_s13 + $0x284] ss:$16 sps:$4 sm:$0xff]   ;;  %v3032_v23 = vld [vmem:[%s3668_s13 + $0x28c] ss:$16 sps:$4 sm:$0xff]  }
  0x9e   : > { %1857 = vmatpush1.bf16.xpose.msra.mxu0 %v2943_v24  ;;  %1898 = vmatpush1.bf16.xpose.msra.mxu1 %v2944_v25  ;;  %v3027_v24 = vld [vmem:[%s3668_s13 + $0x280] ss:$16 sps:$4 sm:$0xff]   ;;  %v3030_v25 = vld [vmem:[%s3668_s13 + $0x288] ss:$16 sps:$4 sm:$0xff]  }
  0x9f   : > { %1858 = vmatprep.subr.bf16.mxu0 %v2945_v26  ;;  %1899 = vmatprep.subr.bf16.mxu1 %v2947_v27  ;;  %v3035_v26 = vld [vmem:[%s3668_s13 + $0x264] ss:$16 sps:$4 sm:$0xff]   ;;  %v3038_v27 = vld [vmem:[%s3668_s13 + $0x26c] ss:$16 sps:$4 sm:$0xff]  }
  0xa6   : > { %1859 = vmatpush1.bf16.xpose.msra.mxu0 %v2949_v32  ;;  %1900 = vmatpush1.bf16.xpose.msra.mxu1 %v2950_v33  ;;  %v3041_v32 = vld [vmem:[%s3668_s13 + $0x244] ss:$16 sps:$4 sm:$0xff]   ;;  %v3044_v33 = vld [vmem:[%s3668_s13 + $0x24c] ss:$16 sps:$4 sm:$0xff]  }
  0xa7   : > { %1860 = vmatprep.subr.bf16.mxu0 %v2951_v34  ;;  %1901 = vmatprep.subr.bf16.mxu1 %v2953_v35  ;;  %v3039_v34 = vld [vmem:[%s3668_s13 + $0x240] ss:$16 sps:$4 sm:$0xff]   ;;  %v3042_v35 = vld [vmem:[%s3668_s13 + $0x248] ss:$16 sps:$4 sm:$0xff]  }
  0xae   : > { %1861 = vmatpush1.bf16.xpose.msra.mxu0 %v2955_v36  ;;  %1902 = vmatpush1.bf16.xpose.msra.mxu1 %v2956_v37  ;;  %v3047_v36 = vld [vmem:[%s3668_s13 + $0x224] ss:$16 sps:$4 sm:$0xff]   ;;  %v3050_v37 = vld [vmem:[%s3668_s13 + $0x22c] ss:$16 sps:$4 sm:$0xff]  }
  0xaf   : > { %1862 = vmatprep.subr.bf16.mxu0 %v2957_v38  ;;  %1903 = vmatprep.subr.bf16.mxu1 %v2959_v39  ;;  %v3045_v38 = vld [vmem:[%s3668_s13 + $0x220] ss:$16 sps:$4 sm:$0xff]   ;;  %v3048_v39 = vld [vmem:[%s3668_s13 + $0x228] ss:$16 sps:$4 sm:$0xff]  }
  0xb6   : > { %1863 = vmatpush2.bf16.xpose.msra.mxu0 %v2961_v40  ;;  %1904 = vmatpush2.bf16.xpose.msra.mxu1 %v2962_v41  ;;  %v3053_v40 = vld [vmem:[%s3668_s13 + $0x204] ss:$16 sps:$4 sm:$0xff]   ;;  %v3056_v41 = vld [vmem:[%s3668_s13 + $0x20c] ss:$16 sps:$4 sm:$0xff]  }
  0xb7   : > { %1864 = vmatprep.subr.bf16.mxu0 %v2963_v42  ;;  %1905 = vmatprep.subr.bf16.mxu1 %v2965_v43  ;;  %v3051_v42 = vld [vmem:[%s3668_s13 + $0x200] ss:$16 sps:$4 sm:$0xff]   ;;  %v3054_v43 = vld [vmem:[%s3668_s13 + $0x208] ss:$16 sps:$4 sm:$0xff]  }
  0xbe   : > { %1865 = vmatpush2.bf16.xpose.msra.mxu0 %v2967_v45  ;;  %1906 = vmatpush2.bf16.xpose.msra.mxu1 %v2968_v46  ;;  %v3062_v45 = vld [vmem:[%s3668_s13 + $0x3ec] ss:$16 sps:$4 sm:$0xff]   ;;  %v3057_v46 = vld [vmem:[%s3668_s13 + $0x3e0] ss:$16 sps:$4 sm:$0xff]  }
  0xbf   : > { %1866 = vmatprep.subr.bf16.mxu0 %v2969_v48  ;;  %1907 = vmatprep.subr.bf16.mxu1 %v2971_v49  ;;  %v3065_v48 = vld [vmem:[%s3668_s13 + $0x3c4] ss:$16 sps:$4 sm:$0xff]   ;;  %v3068_v49 = vld [vmem:[%s3668_s13 + $0x3cc] ss:$16 sps:$4 sm:$0xff]  }
  0xc6   : > { %1867 = vmatpush2.bf16.xpose.msra.mxu0 %v2973_v50  ;;  %1908 = vmatpush2.bf16.xpose.msra.mxu1 %v2974_v51  ;;  %v3063_v50 = vld [vmem:[%s3668_s13 + $0x3c0] ss:$16 sps:$4 sm:$0xff]   ;;  %v3066_v51 = vld [vmem:[%s3668_s13 + $0x3c8] ss:$16 sps:$4 sm:$0xff]  }
  0xc7   : > { %1868 = vmatprep.subr.bf16.mxu0 %v2975_v52  ;;  %1909 = vmatprep.subr.bf16.mxu1 %v2977_v53  ;;  %v3071_v52 = vld [vmem:[%s3668_s13 + $0x3a4] ss:$16 sps:$4 sm:$0xff]   ;;  %v3074_v53 = vld [vmem:[%s3668_s13 + $0x3ac] ss:$16 sps:$4 sm:$0xff]  }
  0xce   : > { %1869 = vmatpush2.bf16.xpose.msra.mxu0 %v2979_v54  ;;  %1910 = vmatpush2.bf16.xpose.msra.mxu1 %v2980_v55  ;;  %v3069_v54 = vld [vmem:[%s3668_s13 + $0x3a0] ss:$16 sps:$4 sm:$0xff]   ;;  %v3072_v55 = vld [vmem:[%s3668_s13 + $0x3a8] ss:$16 sps:$4 sm:$0xff]  }
  0xcf   : > { %1870 = vmatprep.subr.bf16.mxu0 %v2981_v56  ;;  %1911 = vmatprep.subr.bf16.mxu1 %v2983_v57  ;;  %v3077_v56 = vld [vmem:[%s3668_s13 + $0x384] ss:$16 sps:$4 sm:$0xff]   ;;  %v3080_v57 = vld [vmem:[%s3668_s13 + $0x38c] ss:$16 sps:$4 sm:$0xff]  }
  0xd6   : > { %1871 = vmatpush2.bf16.xpose.msra.mxu0 %v2985_v58  ;;  %1912 = vmatpush2.bf16.xpose.msra.mxu1 %v2986_v59  ;;  %v3075_v58 = vld [vmem:[%s3668_s13 + $0x380] ss:$16 sps:$4 sm:$0xff]   ;;  %v3078_v59 = vld [vmem:[%s3668_s13 + $0x388] ss:$16 sps:$4 sm:$0xff]  }
  0xd7   : > { %1872 = vmatprep.subr.bf16.mxu0 %v2987_v60  ;;  %1913 = vmatprep.subr.bf16.mxu1 %v2989_v61  ;;  %v3083_v60 = vld [vmem:[%s3668_s13 + $0x364] ss:$16 sps:$4 sm:$0xff]   ;;  %v3086_v61 = vld [vmem:[%s3668_s13 + $0x36c] ss:$16 sps:$4 sm:$0xff]  }
  0xde   : > { %1873 = vmatpush2.bf16.xpose.msra.mxu0 %v2991_v62  ;;  %1914 = vmatpush2.bf16.xpose.msra.mxu1 %v2992_v63  ;;  %v3081_v62 = vld [vmem:[%s3668_s13 + $0x360] ss:$16 sps:$4 sm:$0xff]   ;;  %v3084_v63 = vld [vmem:[%s3668_s13 + $0x368] ss:$16 sps:$4 sm:$0xff]  }
  0xdf   : > { %1874 = vmatprep.subr.bf16.mxu0 %v2993_v0  ;;  %1915 = vmatprep.subr.bf16.mxu1 %v2995_v1  ;;  %v3089_v0 = vld [vmem:[%s3668_s13 + $0x344] ss:$16 sps:$4 sm:$0xff]   ;;  %v3092_v1 = vld [vmem:[%s3668_s13 + $0x34c] ss:$16 sps:$4 sm:$0xff]  }
  0xe6   : > { %1875 = vmatpush2.bf16.xpose.msra.mxu0 %v2997_v2  ;;  %1916 = vmatpush2.bf16.xpose.msra.mxu1 %v2998_v3  ;;  %v3087_v2 = vld [vmem:[%s3668_s13 + $0x340] ss:$16 sps:$4 sm:$0xff]   ;;  %v3090_v3 = vld [vmem:[%s3668_s13 + $0x348] ss:$16 sps:$4 sm:$0xff]  }
  0xe7   : > { %1876 = vmatprep.subr.bf16.mxu0 %v2999_v4  ;;  %1917 = vmatprep.subr.bf16.mxu1 %v3001_v5  ;;  %v3095_v4 = vld [vmem:[%s3668_s13 + $0x324] ss:$16 sps:$4 sm:$0xff]   ;;  %v3098_v5 = vld [vmem:[%s3668_s13 + $0x32c] ss:$16 sps:$4 sm:$0xff]  }
  0xee   : > { %1877 = vmatpush2.bf16.xpose.msra.mxu0 %v3003_v6  ;;  %1918 = vmatpush2.bf16.xpose.msra.mxu1 %v3004_v7  ;;  %v3093_v6 = vld [vmem:[%s3668_s13 + $0x320] ss:$16 sps:$4 sm:$0xff]   ;;  %v3096_v7 = vld [vmem:[%s3668_s13 + $0x328] ss:$16 sps:$4 sm:$0xff]  }
  0xef   : > { %1928 = vmatprep.subr.bf16.mxu0 %v3011_v8  ;;  %1969 = vmatprep.subr.bf16.mxu1 %v3014_v9  ;;  %v3101_v8 = vld [vmem:[%s3668_s13 + $0x304] ss:$16 sps:$4 sm:$0xff]   ;;  %v3104_v9 = vld [vmem:[%s3668_s13 + $0x30c] ss:$16 sps:$4 sm:$0xff]  }
  0xf5   : > { %1879 = vmatmul.mubr.bf16.vlgmr.msra.gmra.mxu0 %v3777_v12  ;;  %1920 = vmatmul.mubr.bf16.vlgmr.msra.gmra.mxu1 %v3781_v13 }
  0xf6   : > { %1929 = vmatpush1.bf16.xpose.msra.mxu0 %v3009_v10  ;;  %1970 = vmatpush1.bf16.xpose.msra.mxu1 %v3012_v11  ;;  %v3099_v10 = vld [vmem:[%s3668_s13 + $0x300] ss:$16 sps:$4 sm:$0xff]   ;;  %v3102_v11 = vld [vmem:[%s3668_s13 + $0x308] ss:$16 sps:$4 sm:$0xff]  }
  0xf7   : > { %1930 = vmatprep.subr.bf16.mxu0 %v3017_v14  ;;  %1971 = vmatprep.subr.bf16.mxu1 %v3020_v15  ;;  %v3107_v14 = vld [vmem:[%s3668_s13 + $0x4e4] ss:$16 sps:$4 sm:$0xff]   ;;  %v3110_v15 = vld [vmem:[%s3668_s13 + $0x4ec] ss:$16 sps:$4 sm:$0xff]  }
  0xf8   : > { %1960 = vmatprep.mubr.bf16.mxu0 %v3720_v29  ;;  %2001 = vmatprep.mubr.bf16.mxu1 %v3726_v31 }
  0xfe   : > { %1931 = vmatpush1.bf16.xpose.msra.mxu0 %v3015_v16  ;;  %1972 = vmatpush1.bf16.xpose.msra.mxu1 %v3018_v17  ;;  %v3105_v16 = vld [vmem:[%s3668_s13 + $0x4e0] ss:$16 sps:$4 sm:$0xff]   ;;  %v3108_v17 = vld [vmem:[%s3668_s13 + $0x4e8] ss:$16 sps:$4 sm:$0xff]  }
  0xff   : > { %1932 = vmatprep.subr.bf16.mxu0 %v3023_v18  ;;  %1973 = vmatprep.subr.bf16.mxu1 %v3026_v19  ;;  %v3113_v18 = vld [vmem:[%s3668_s13 + $0x4c4] ss:$16 sps:$4 sm:$0xff]   ;;  %v3116_v19 = vld [vmem:[%s3668_s13 + $0x4cc] ss:$16 sps:$4 sm:$0xff]  }
 0x106   : > { %1933 = vmatpush1.bf16.xpose.msra.mxu0 %v3021_v20  ;;  %1974 = vmatpush1.bf16.xpose.msra.mxu1 %v3024_v21  ;;  %v3111_v20 = vld [vmem:[%s3668_s13 + $0x4c0] ss:$16 sps:$4 sm:$0xff]   ;;  %v3114_v21 = vld [vmem:[%s3668_s13 + $0x4c8] ss:$16 sps:$4 sm:$0xff]  }
 0x107   : > { %1934 = vmatprep.subr.bf16.mxu0 %v3029_v22  ;;  %1975 = vmatprep.subr.bf16.mxu1 %v3032_v23  ;;  %v3119_v22 = vld [vmem:[%s3668_s13 + $0x4a4] ss:$16 sps:$4 sm:$0xff]   ;;  %v3122_v23 = vld [vmem:[%s3668_s13 + $0x4ac] ss:$16 sps:$4 sm:$0xff]  }
 0x10e   : > { %1935 = vmatpush1.bf16.xpose.msra.mxu0 %v3027_v24  ;;  %1976 = vmatpush1.bf16.xpose.msra.mxu1 %v3030_v25  ;;  %v3117_v24 = vld [vmem:[%s3668_s13 + $0x4a0] ss:$16 sps:$4 sm:$0xff]   ;;  %v3120_v25 = vld [vmem:[%s3668_s13 + $0x4a8] ss:$16 sps:$4 sm:$0xff]  }
 0x10f   : > { %1936 = vmatprep.subr.bf16.mxu0 %v3035_v26  ;;  %1977 = vmatprep.subr.bf16.mxu1 %v3038_v27  ;;  %v3125_v26 = vld [vmem:[%s3668_s13 + $0x484] ss:$16 sps:$4 sm:$0xff]   ;;  %v3128_v27 = vld [vmem:[%s3668_s13 + $0x48c] ss:$16 sps:$4 sm:$0xff]  }
 0x116   : > { %1937 = vmatpush1.bf16.xpose.msra.mxu0 %v3033_v28  ;;  %1978 = vmatpush1.bf16.xpose.msra.mxu1 %v3036_v30  ;;  %v3123_v28 = vld [vmem:[%s3668_s13 + $0x480] ss:$16 sps:$4 sm:$0xff]   ;;  %v3126_v30 = vld [vmem:[%s3668_s13 + $0x488] ss:$16 sps:$4 sm:$0xff]  }
 0x117   : > { %1938 = vmatprep.subr.bf16.mxu0 %v3041_v32  ;;  %1979 = vmatprep.subr.bf16.mxu1 %v3044_v33  ;;  %v3131_v32 = vld [vmem:[%s3668_s13 + $0x464] ss:$16 sps:$4 sm:$0xff]   ;;  %v3134_v33 = vld [vmem:[%s3668_s13 + $0x46c] ss:$16 sps:$4 sm:$0xff]  }
 0x11e   : > { %1939 = vmatpush1.bf16.xpose.msra.mxu0 %v3039_v34  ;;  %1980 = vmatpush1.bf16.xpose.msra.mxu1 %v3042_v35  ;;  %v3129_v34 = vld [vmem:[%s3668_s13 + $0x460] ss:$16 sps:$4 sm:$0xff]   ;;  %v3132_v35 = vld [vmem:[%s3668_s13 + $0x468] ss:$16 sps:$4 sm:$0xff]  }
 0x11f   : > { %1940 = vmatprep.subr.bf16.mxu0 %v3047_v36  ;;  %1981 = vmatprep.subr.bf16.mxu1 %v3050_v37  ;;  %v3137_v36 = vld [vmem:[%s3668_s13 + $0x444] ss:$16 sps:$4 sm:$0xff]   ;;  %v3140_v37 = vld [vmem:[%s3668_s13 + $0x44c] ss:$16 sps:$4 sm:$0xff]  }
 0x126   : > { %1941 = vmatpush1.bf16.xpose.msra.mxu0 %v3045_v38  ;;  %1982 = vmatpush1.bf16.xpose.msra.mxu1 %v3048_v39  ;;  %v3135_v38 = vld [vmem:[%s3668_s13 + $0x440] ss:$16 sps:$4 sm:$0xff]   ;;  %v3138_v39 = vld [vmem:[%s3668_s13 + $0x448] ss:$16 sps:$4 sm:$0xff]  }
 0x127   : > { %1942 = vmatprep.subr.bf16.mxu0 %v3053_v40  ;;  %1983 = vmatprep.subr.bf16.mxu1 %v3056_v41  ;;  %v3143_v40 = vld [vmem:[%s3668_s13 + $0x424] ss:$16 sps:$4 sm:$0xff]   ;;  %v3146_v41 = vld [vmem:[%s3668_s13 + $0x42c] ss:$16 sps:$4 sm:$0xff]  }
 0x12e   : > { %1943 = vmatpush1.bf16.xpose.msra.mxu0 %v3051_v42  ;;  %1984 = vmatpush1.bf16.xpose.msra.mxu1 %v3054_v43  ;;  %v3141_v42 = vld [vmem:[%s3668_s13 + $0x420] ss:$16 sps:$4 sm:$0xff]   ;;  %v3144_v43 = vld [vmem:[%s3668_s13 + $0x428] ss:$16 sps:$4 sm:$0xff]  }
 0x12f   : > { %1944 = vmatprep.subr.bf16.mxu0 %v3059_v44  ;;  %1985 = vmatprep.subr.bf16.mxu1 %v3062_v45  ;;  %v3149_v44 = vld [vmem:[%s3668_s13 + $0x404] ss:$16 sps:$4 sm:$0xff]   ;;  %v3152_v45 = vld [vmem:[%s3668_s13 + $0x40c] ss:$16 sps:$4 sm:$0xff]  }
 0x136   : > { %1945 = vmatpush2.bf16.xpose.msra.mxu0 %v3057_v46  ;;  %1986 = vmatpush2.bf16.xpose.msra.mxu1 %v3060_v47  ;;  %v3147_v46 = vld [vmem:[%s3668_s13 + $0x400] ss:$16 sps:$4 sm:$0xff]   ;;  %v3150_v47 = vld [vmem:[%s3668_s13 + $0x408] ss:$16 sps:$4 sm:$0xff]  }
 0x137   : > { %1946 = vmatprep.subr.bf16.mxu0 %v3065_v48  ;;  %1987 = vmatprep.subr.bf16.mxu1 %v3068_v49  ;;  %v3155_v48 = vld [vmem:[%s3668_s13 + $0x5e4] ss:$16 sps:$4 sm:$0xff]   ;;  %v3158_v49 = vld [vmem:[%s3668_s13 + $0x5ec] ss:$16 sps:$4 sm:$0xff]  }
 0x13e   : > { %1947 = vmatpush2.bf16.xpose.msra.mxu0 %v3063_v50  ;;  %1988 = vmatpush2.bf16.xpose.msra.mxu1 %v3066_v51  ;;  %v3153_v50 = vld [vmem:[%s3668_s13 + $0x5e0] ss:$16 sps:$4 sm:$0xff]   ;;  %v3156_v51 = vld [vmem:[%s3668_s13 + $0x5e8] ss:$16 sps:$4 sm:$0xff]  }
 0x13f   : > { %1948 = vmatprep.subr.bf16.mxu0 %v3071_v52  ;;  %1989 = vmatprep.subr.bf16.mxu1 %v3074_v53  ;;  %v3161_v52 = vld [vmem:[%s3668_s13 + $0x5c4] ss:$16 sps:$4 sm:$0xff]   ;;  %v3164_v53 = vld [vmem:[%s3668_s13 + $0x5cc] ss:$16 sps:$4 sm:$0xff]  }
 0x146   : > { %1949 = vmatpush2.bf16.xpose.msra.mxu0 %v3069_v54  ;;  %1990 = vmatpush2.bf16.xpose.msra.mxu1 %v3072_v55 }
 0x147   : > { %1950 = vmatprep.subr.bf16.mxu0 %v3077_v56  ;;  %1991 = vmatprep.subr.bf16.mxu1 %v3080_v57 }
 0x14e   : > { %1951 = vmatpush2.bf16.xpose.msra.mxu0 %v3075_v58  ;;  %1992 = vmatpush2.bf16.xpose.msra.mxu1 %v3078_v59 }
 0x14f   : > { %1952 = vmatprep.subr.bf16.mxu0 %v3083_v60  ;;  %1993 = vmatprep.subr.bf16.mxu1 %v3086_v61 }
 0x156   : > { %1953 = vmatpush2.bf16.xpose.msra.mxu0 %v3081_v62  ;;  %1994 = vmatpush2.bf16.xpose.msra.mxu1 %v3084_v63  ;;  %v3159_v62 = vld [vmem:[%s3668_s13 + $0x5c0] ss:$16 sps:$4 sm:$0xff]   ;;  %v3162_v63 = vld [vmem:[%s3668_s13 + $0x5c8] ss:$16 sps:$4 sm:$0xff]  }
 0x157   : > { %1954 = vmatprep.subr.bf16.mxu0 %v3089_v0  ;;  %1995 = vmatprep.subr.bf16.mxu1 %v3092_v1 }
 0x15e   : > { %1955 = vmatpush2.bf16.xpose.msra.mxu0 %v3087_v2  ;;  %1996 = vmatpush2.bf16.xpose.msra.mxu1 %v3090_v3  ;;  %v3167_v2 = vld [vmem:[%s3668_s13 + $0x5a4] ss:$16 sps:$4 sm:$0xff]   ;;  %v3170_v3 = vld [vmem:[%s3668_s13 + $0x5ac] ss:$16 sps:$4 sm:$0xff]  }
 0x15f   : > { %1956 = vmatprep.subr.bf16.mxu0 %v3095_v4  ;;  %1997 = vmatprep.subr.bf16.mxu1 %v3098_v5  ;;  %v3165_v4 = vld [vmem:[%s3668_s13 + $0x5a0] ss:$16 sps:$4 sm:$0xff]   ;;  %v3168_v5 = vld [vmem:[%s3668_s13 + $0x5a8] ss:$16 sps:$4 sm:$0xff]  }
 0x166   : > { %1957 = vmatpush2.bf16.xpose.msra.mxu0 %v3093_v6  ;;  %1998 = vmatpush2.bf16.xpose.msra.mxu1 %v3096_v7  ;;  %v3173_v6 = vld [vmem:[%s3668_s13 + $0x584] ss:$16 sps:$4 sm:$0xff]   ;;  %v3176_v7 = vld [vmem:[%s3668_s13 + $0x58c] ss:$16 sps:$4 sm:$0xff]  }
 0x167   : > { %1958 = vmatprep.subr.bf16.mxu0 %v3101_v8  ;;  %1999 = vmatprep.subr.bf16.mxu1 %v3104_v9  ;;  %v3171_v8 = vld [vmem:[%s3668_s13 + $0x580] ss:$16 sps:$4 sm:$0xff]   ;;  %v3174_v9 = vld [vmem:[%s3668_s13 + $0x588] ss:$16 sps:$4 sm:$0xff]  }
 0x16e   : > { %1959 = vmatpush2.bf16.xpose.msra.mxu0 %v3099_v10  ;;  %2000 = vmatpush2.bf16.xpose.msra.mxu1 %v3102_v11  ;;  %v3179_v10 = vld [vmem:[%s3668_s13 + $0x564] ss:$16 sps:$4 sm:$0xff]   ;;  %v3182_v11 = vld [vmem:[%s3668_s13 + $0x56c] ss:$16 sps:$4 sm:$0xff]  }
 0x16f   : > { %2010 = vmatprep.subr.bf16.mxu0 %v3107_v14  ;;  %2051 = vmatprep.subr.bf16.mxu1 %v3110_v15  ;;  %v3177_v14 = vld [vmem:[%s3668_s13 + $0x560] ss:$16 sps:$4 sm:$0xff]   ;;  %v3180_v15 = vld [vmem:[%s3668_s13 + $0x568] ss:$16 sps:$4 sm:$0xff]  }
 0x175   : > { %1961 = vmatmul.mubr.bf16.vlgmr.msra.gmra.mxu0 %v3777_v12  ;;  %2002 = vmatmul.mubr.bf16.vlgmr.msra.gmra.mxu1 %v3781_v13 }
 0x176   : > { %2011 = vmatpush1.bf16.xpose.msra.mxu0 %v3105_v16  ;;  %2052 = vmatpush1.bf16.xpose.msra.mxu1 %v3108_v17  ;;  %v3185_v16 = vld [vmem:[%s3668_s13 + $0x544] ss:$16 sps:$4 sm:$0xff]   ;;  %v3188_v17 = vld [vmem:[%s3668_s13 + $0x54c] ss:$16 sps:$4 sm:$0xff]  }
 0x177   : > { %2012 = vmatprep.subr.bf16.mxu0 %v3113_v18  ;;  %2053 = vmatprep.subr.bf16.mxu1 %v3116_v19  ;;  %v3183_v18 = vld [vmem:[%s3668_s13 + $0x540] ss:$16 sps:$4 sm:$0xff]   ;;  %v3186_v19 = vld [vmem:[%s3668_s13 + $0x548] ss:$16 sps:$4 sm:$0xff]  }
 0x178   : > { %2042 = vmatprep.mubr.bf16.mxu0 %v3720_v29  ;;  %2083 = vmatprep.mubr.bf16.mxu1 %v3726_v31 }
 0x17e   : > { %2013 = vmatpush1.bf16.xpose.msra.mxu0 %v3111_v20  ;;  %2054 = vmatpush1.bf16.xpose.msra.mxu1 %v3114_v21  ;;  %v3191_v20 = vld [vmem:[%s3668_s13 + $0x524] ss:$16 sps:$4 sm:$0xff]   ;;  %v3194_v21 = vld [vmem:[%s3668_s13 + $0x52c] ss:$16 sps:$4 sm:$0xff]  }
 0x17f   : > { %2014 = vmatprep.subr.bf16.mxu0 %v3119_v22  ;;  %2055 = vmatprep.subr.bf16.mxu1 %v3122_v23  ;;  %v3189_v22 = vld [vmem:[%s3668_s13 + $0x520] ss:$16 sps:$4 sm:$0xff]   ;;  %v3192_v23 = vld [vmem:[%s3668_s13 + $0x528] ss:$16 sps:$4 sm:$0xff]  }
 0x186   : > { %2015 = vmatpush1.bf16.xpose.msra.mxu0 %v3117_v24  ;;  %2056 = vmatpush1.bf16.xpose.msra.mxu1 %v3120_v25  ;;  %v3197_v24 = vld [vmem:[%s3668_s13 + $0x504] ss:$16 sps:$4 sm:$0xff]   ;;  %v3200_v25 = vld [vmem:[%s3668_s13 + $0x50c] ss:$16 sps:$4 sm:$0xff]  }
 0x187   : > { %2016 = vmatprep.subr.bf16.mxu0 %v3125_v26  ;;  %2057 = vmatprep.subr.bf16.mxu1 %v3128_v27  ;;  %v3195_v26 = vld [vmem:[%s3668_s13 + $0x500] ss:$16 sps:$4 sm:$0xff]   ;;  %v3198_v27 = vld [vmem:[%s3668_s13 + $0x508] ss:$16 sps:$4 sm:$0xff]  }
 0x18e   : > { %2017 = vmatpush1.bf16.xpose.msra.mxu0 %v3123_v28  ;;  %2058 = vmatpush1.bf16.xpose.msra.mxu1 %v3126_v30  ;;  %v3203_v28 = vld [vmem:[%s3668_s13 + $0x6e4] ss:$16 sps:$4 sm:$0xff]   ;;  %v3206_v30 = vld [vmem:[%s3668_s13 + $0x6ec] ss:$16 sps:$4 sm:$0xff]  }
 0x18f   : > { %2018 = vmatprep.subr.bf16.mxu0 %v3131_v32  ;;  %2059 = vmatprep.subr.bf16.mxu1 %v3134_v33  ;;  %v3201_v32 = vld [vmem:[%s3668_s13 + $0x6e0] ss:$16 sps:$4 sm:$0xff]   ;;  %v3204_v33 = vld [vmem:[%s3668_s13 + $0x6e8] ss:$16 sps:$4 sm:$0xff]  }
 0x196   : > { %2019 = vmatpush1.bf16.xpose.msra.mxu0 %v3129_v34  ;;  %2060 = vmatpush1.bf16.xpose.msra.mxu1 %v3132_v35  ;;  %v3209_v34 = vld [vmem:[%s3668_s13 + $0x6c4] ss:$16 sps:$4 sm:$0xff]   ;;  %v3212_v35 = vld [vmem:[%s3668_s13 + $0x6cc] ss:$16 sps:$4 sm:$0xff]  }
 0x197   : > { %2020 = vmatprep.subr.bf16.mxu0 %v3137_v36  ;;  %2061 = vmatprep.subr.bf16.mxu1 %v3140_v37  ;;  %v3207_v36 = vld [vmem:[%s3668_s13 + $0x6c0] ss:$16 sps:$4 sm:$0xff]   ;;  %v3210_v37 = vld [vmem:[%s3668_s13 + $0x6c8] ss:$16 sps:$4 sm:$0xff]  }
 0x19e   : > { %2021 = vmatpush1.bf16.xpose.msra.mxu0 %v3135_v38  ;;  %2062 = vmatpush1.bf16.xpose.msra.mxu1 %v3138_v39  ;;  %v3215_v38 = vld [vmem:[%s3668_s13 + $0x6a4] ss:$16 sps:$4 sm:$0xff]   ;;  %v3218_v39 = vld [vmem:[%s3668_s13 + $0x6ac] ss:$16 sps:$4 sm:$0xff]  }
 0x19f   : > { %2022 = vmatprep.subr.bf16.mxu0 %v3143_v40  ;;  %2063 = vmatprep.subr.bf16.mxu1 %v3146_v41  ;;  %v3213_v40 = vld [vmem:[%s3668_s13 + $0x6a0] ss:$16 sps:$4 sm:$0xff]   ;;  %v3216_v41 = vld [vmem:[%s3668_s13 + $0x6a8] ss:$16 sps:$4 sm:$0xff]  }
 0x1a6   : > { %2023 = vmatpush1.bf16.xpose.msra.mxu0 %v3141_v42  ;;  %2064 = vmatpush1.bf16.xpose.msra.mxu1 %v3144_v43  ;;  %v3221_v42 = vld [vmem:[%s3668_s13 + $0x684] ss:$16 sps:$4 sm:$0xff]   ;;  %v3222_v43 = vld [vmem:[%s3668_s13 + $0x688] ss:$16 sps:$4 sm:$0xff]  }
 0x1a7   : > { %2024 = vmatprep.subr.bf16.mxu0 %v3149_v44  ;;  %2065 = vmatprep.subr.bf16.mxu1 %v3152_v45  ;;  %v3227_v44 = vld [vmem:[%s3668_s13 + $0x664] ss:$16 sps:$4 sm:$0xff]   ;;  %v3230_v45 = vld [vmem:[%s3668_s13 + $0x66c] ss:$16 sps:$4 sm:$0xff]  }
 0x1ae   : > { %2025 = vmatpush1.bf16.xpose.msra.mxu0 %v3147_v46  ;;  %2066 = vmatpush1.bf16.xpose.msra.mxu1 %v3150_v47  ;;  %v3225_v46 = vld [vmem:[%s3668_s13 + $0x660] ss:$16 sps:$4 sm:$0xff]   ;;  %v3228_v47 = vld [vmem:[%s3668_s13 + $0x668] ss:$16 sps:$4 sm:$0xff]  }
 0x1af   : > { %2026 = vmatprep.subr.bf16.mxu0 %v3155_v48  ;;  %2067 = vmatprep.subr.bf16.mxu1 %v3158_v49  ;;  %v3233_v48 = vld [vmem:[%s3668_s13 + $0x644] ss:$16 sps:$4 sm:$0xff]   ;;  %v3236_v49 = vld [vmem:[%s3668_s13 + $0x64c] ss:$16 sps:$4 sm:$0xff]  }
 0x1b5   : > { %v1880_v54 = vpop.f32.mrf.mxu0  ;;  %v1921_v55 = vpop.f32.mrf.mxu1 }
 0x1b6   : > { %v3889_v56 = vadd.f32 %v1921_v55, %v1880_v54  ;;  %2027 = vmatpush2.bf16.xpose.msra.mxu0 %v3153_v50  ;;  %2068 = vmatpush2.bf16.xpose.msra.mxu1 %v3156_v51  ;;  %v3231_v50 = vld [vmem:[%s3668_s13 + $0x640] ss:$16 sps:$4 sm:$0xff]   ;;  %v3234_v51 = vld [vmem:[%s3668_s13 + $0x648] ss:$16 sps:$4 sm:$0xff]  }
 0x1b7   : > { %v1882_v57 = vpop.f32.mrf.mxu0  ;;  %v1923_v58 = vpop.f32.mrf.mxu1  ;;  %2028 = vmatprep.subr.bf16.mxu0 %v3161_v52  ;;  %2069 = vmatprep.subr.bf16.mxu1 %v3164_v53  ;;  %v3239_v52 = vld [vmem:[%s3668_s13 + $0x624] ss:$16 sps:$4 sm:$0xff]   ;;  %v3242_v53 = vld [vmem:[%s3668_s13 + $0x62c] ss:$16 sps:$4 sm:$0xff]   ;;  %v3237_v54 = vld [vmem:[%s3668_s13 + $0x620] ss:$16 sps:$4 sm:$0xff]  }
 0x1b8   : > { %v3891_v59 = vadd.f32 %v1923_v58, %v1882_v57  ;;  %v3240_v55 = vld [vmem:[%s3668_s13 + $0x628] ss:$16 sps:$4 sm:$0xff]   ;;  %v3245_v57 = vld [vmem:[%s3668_s13 + $0x604] ss:$16 sps:$4 sm:$0xff]   ;;  %v3248_v58 = vld [vmem:[%s3668_s13 + $0x60c] ss:$16 sps:$4 sm:$0xff]  }
 0x1b9   : > { %v1884_v60 = vpop.f32.mrf.mxu0  ;;  %v1925_v61 = vpop.f32.mrf.mxu1 }
 0x1ba   : > { %v3243_v60 = vld [vmem:[%s3668_s13 + $0x600] ss:$16 sps:$4 sm:$0xff]   ;;  %v3246_v61 = vld [vmem:[%s3668_s13 + $0x608] ss:$16 sps:$4 sm:$0xff]  }
 0x1bb   : > { %v1885_v0 = vpop.f32.mrf.mxu0  ;;  %v1926_v1 = vpop.f32.mrf.mxu1 }
 0x1bc   : > { %v3249_v0 = vld [vmem:[%s3668_s13 + $0x7e0] ss:$16 sps:$4 sm:$0xff]   ;;  %v3252_v1 = vld [vmem:[%s3668_s13 + $0x7e8] ss:$16 sps:$4 sm:$0xff]  }
 0x1be   : > { %2029 = vmatpush2.bf16.xpose.msra.mxu0 %v3159_v62  ;;  %2070 = vmatpush2.bf16.xpose.msra.mxu1 %v3162_v63  ;;  %v3251_v62 = vld [vmem:[%s3668_s13 + $0x7e4] ss:$16 sps:$4 sm:$0xff]   ;;  %v3254_v63 = vld [vmem:[%s3668_s13 + $0x7ec] ss:$16 sps:$4 sm:$0xff]  }
 0x1bf   : > { %2030 = vmatprep.subr.bf16.mxu0 %v3167_v2  ;;  %2071 = vmatprep.subr.bf16.mxu1 %v3170_v3  ;;  %v3257_v2 = vld [vmem:[%s3668_s13 + $0x7c4] ss:$16 sps:$4 sm:$0xff]   ;;  %v3260_v3 = vld [vmem:[%s3668_s13 + $0x7cc] ss:$16 sps:$4 sm:$0xff]  }
 0x1c6   : > { %2031 = vmatpush2.bf16.xpose.msra.mxu0 %v3165_v4  ;;  %2072 = vmatpush2.bf16.xpose.msra.mxu1 %v3168_v5 }
 0x1c7   : > { %2032 = vmatprep.subr.bf16.mxu0 %v3173_v6  ;;  %2073 = vmatprep.subr.bf16.mxu1 %v3176_v7 }
 0x1ce   : > { %2033 = vmatpush2.bf16.xpose.msra.mxu0 %v3171_v8  ;;  %2074 = vmatpush2.bf16.xpose.msra.mxu1 %v3174_v9 }
 0x1cf   : > { %2034 = vmatprep.subr.bf16.mxu0 %v3179_v10  ;;  %2075 = vmatprep.subr.bf16.mxu1 %v3182_v11 }
 0x1d6   : > { %2035 = vmatpush2.bf16.xpose.msra.mxu0 %v3177_v14  ;;  %2076 = vmatpush2.bf16.xpose.msra.mxu1 %v3180_v15  ;;  %v3255_v14 = vld [vmem:[%s3668_s13 + $0x7c0] ss:$16 sps:$4 sm:$0xff]   ;;  %v3258_v15 = vld [vmem:[%s3668_s13 + $0x7c8] ss:$16 sps:$4 sm:$0xff]  }
 0x1d7   : > { %2036 = vmatprep.subr.bf16.mxu0 %v3185_v16  ;;  %2077 = vmatprep.subr.bf16.mxu1 %v3188_v17 }
 0x1de   : > { %2037 = vmatpush2.bf16.xpose.msra.mxu0 %v3183_v18  ;;  %2078 = vmatpush2.bf16.xpose.msra.mxu1 %v3186_v19  ;;  %v3263_v18 = vld [vmem:[%s3668_s13 + $0x7a4] ss:$16 sps:$4 sm:$0xff]   ;;  %v3266_v19 = vld [vmem:[%s3668_s13 + $0x7ac] ss:$16 sps:$4 sm:$0xff]  }
 0x1df   : > { %2038 = vmatprep.subr.bf16.mxu0 %v3191_v20  ;;  %2079 = vmatprep.subr.bf16.mxu1 %v3194_v21  ;;  %v3261_v20 = vld [vmem:[%s3668_s13 + $0x7a0] ss:$16 sps:$4 sm:$0xff]   ;;  %v3264_v21 = vld [vmem:[%s3668_s13 + $0x7a8] ss:$16 sps:$4 sm:$0xff]  }
 0x1e6   : > { %2039 = vmatpush2.bf16.xpose.msra.mxu0 %v3189_v22  ;;  %2080 = vmatpush2.bf16.xpose.msra.mxu1 %v3192_v23  ;;  %v3269_v22 = vld [vmem:[%s3668_s13 + $0x784] ss:$16 sps:$4 sm:$0xff]   ;;  %v3272_v23 = vld [vmem:[%s3668_s13 + $0x78c] ss:$16 sps:$4 sm:$0xff]  }
 0x1e7   : > { %2040 = vmatprep.subr.bf16.mxu0 %v3197_v24  ;;  %2081 = vmatprep.subr.bf16.mxu1 %v3200_v25  ;;  %v3267_v24 = vld [vmem:[%s3668_s13 + $0x780] ss:$16 sps:$4 sm:$0xff]   ;;  %v3270_v25 = vld [vmem:[%s3668_s13 + $0x788] ss:$16 sps:$4 sm:$0xff]  }
 0x1ee   : > { %2041 = vmatpush2.bf16.xpose.msra.mxu0 %v3195_v26  ;;  %2082 = vmatpush2.bf16.xpose.msra.mxu1 %v3198_v27  ;;  %v3275_v26 = vld [vmem:[%s3668_s13 + $0x764] ss:$16 sps:$4 sm:$0xff]   ;;  %v3278_v27 = vld [vmem:[%s3668_s13 + $0x76c] ss:$16 sps:$4 sm:$0xff]  }
 0x1ef   : > { %2092 = vmatprep.subr.bf16.mxu0 %v3203_v28  ;;  %2133 = vmatprep.subr.bf16.mxu1 %v3206_v30  ;;  %v3273_v28 = vld [vmem:[%s3668_s13 + $0x760] ss:$16 sps:$4 sm:$0xff]   ;;  %v3276_v30 = vld [vmem:[%s3668_s13 + $0x768] ss:$16 sps:$4 sm:$0xff]  }
 0x1f5   : > { %2043 = vmatmul.mubr.bf16.vlgmr.msra.gmra.mxu0 %v3777_v12  ;;  %2084 = vmatmul.mubr.bf16.vlgmr.msra.gmra.mxu1 %v3781_v13 }
 0x1f6   : > { %2093 = vmatpush1.bf16.xpose.msra.mxu0 %v3201_v32  ;;  %2134 = vmatpush1.bf16.xpose.msra.mxu1 %v3204_v33  ;;  %v3281_v32 = vld [vmem:[%s3668_s13 + $0x744] ss:$16 sps:$4 sm:$0xff]   ;;  %v3284_v33 = vld [vmem:[%s3668_s13 + $0x74c] ss:$16 sps:$4 sm:$0xff]  }
 0x1f7   : > { %2094 = vmatprep.subr.bf16.mxu0 %v3209_v34  ;;  %2135 = vmatprep.subr.bf16.mxu1 %v3212_v35  ;;  %v3279_v34 = vld [vmem:[%s3668_s13 + $0x740] ss:$16 sps:$4 sm:$0xff]   ;;  %v3282_v35 = vld [vmem:[%s3668_s13 + $0x748] ss:$16 sps:$4 sm:$0xff]  }
 0x1f8   : > { %2124 = vmatprep.mubr.bf16.mxu0 %v3720_v29  ;;  %2165 = vmatprep.mubr.bf16.mxu1 %v3726_v31  ;;  %v3224_v29 = vld [vmem:[%s3668_s13 + $0x68c] ss:$16 sps:$4 sm:$0xff]   ;;  %v3219_v31 = vld [vmem:[%s3668_s13 + $0x680] ss:$16 sps:$4 sm:$0xff]  }
 0x1fe   : > { %2095 = vmatpush1.bf16.xpose.msra.mxu0 %v3207_v36  ;;  %2136 = vmatpush1.bf16.xpose.msra.mxu1 %v3210_v37  ;;  %v3287_v36 = vld [vmem:[%s3668_s13 + $0x724] ss:$16 sps:$4 sm:$0xff]   ;;  %v3290_v37 = vld [vmem:[%s3668_s13 + $0x72c] ss:$16 sps:$4 sm:$0xff]  }
 0x1ff   : > { %2096 = vmatprep.subr.bf16.mxu0 %v3215_v38  ;;  %2137 = vmatprep.subr.bf16.mxu1 %v3218_v39  ;;  %v3285_v38 = vld [vmem:[%s3668_s13 + $0x720] ss:$16 sps:$4 sm:$0xff]   ;;  %v3288_v39 = vld [vmem:[%s3668_s13 + $0x728] ss:$16 sps:$4 sm:$0xff]  }
 0x206   : > { %2097 = vmatpush1.bf16.xpose.msra.mxu0 %v3213_v40  ;;  %2138 = vmatpush1.bf16.xpose.msra.mxu1 %v3216_v41  ;;  %v3293_v40 = vld [vmem:[%s3668_s13 + $0x704] ss:$16 sps:$4 sm:$0xff]   ;;  %v3296_v41 = vld [vmem:[%s3668_s13 + $0x70c] ss:$16 sps:$4 sm:$0xff]  }
 0x207   : > { %2098 = vmatprep.subr.bf16.mxu0 %v3221_v42  ;;  %2139 = vmatprep.subr.bf16.mxu1 %v3224_v29  ;;  %v3291_v42 = vld [vmem:[%s3668_s13 + $0x700] ss:$16 sps:$4 sm:$0xff]   ;;  %v3294_v29 = vld [vmem:[%s3668_s13 + $0x708] ss:$16 sps:$4 sm:$0xff]  }
 0x20e   : > { %2099 = vmatpush1.bf16.xpose.msra.mxu0 %v3219_v31  ;;  %2140 = vmatpush1.bf16.xpose.msra.mxu1 %v3222_v43 }
 0x20f   : > { %2100 = vmatprep.subr.bf16.mxu0 %v3227_v44  ;;  %2141 = vmatprep.subr.bf16.mxu1 %v3230_v45 }
 0x216   : > { %2101 = vmatpush1.bf16.xpose.msra.mxu0 %v3225_v46  ;;  %2142 = vmatpush1.bf16.xpose.msra.mxu1 %v3228_v47 }
 0x217   : > { %2102 = vmatprep.subr.bf16.mxu0 %v3233_v48  ;;  %2143 = vmatprep.subr.bf16.mxu1 %v3236_v49 }
 0x21e   : > { %2103 = vmatpush1.bf16.xpose.msra.mxu0 %v3231_v50  ;;  %2144 = vmatpush1.bf16.xpose.msra.mxu1 %v3234_v51 }
 0x21f   : > { %2104 = vmatprep.subr.bf16.mxu0 %v3239_v52  ;;  %2145 = vmatprep.subr.bf16.mxu1 %v3242_v53  ;;  %v2175_v52 = vlaneseq }
 0x221   : > { %v3998_v53 = vshrl.u32 %v2175_v52, 7 }
 0x226   : > { %2105 = vmatpush1.bf16.xpose.msra.mxu0 %v3237_v54  ;;  %2146 = vmatpush1.bf16.xpose.msra.mxu1 %v3240_v55  ;;  %v4001_v54 = vstv %s2797_s10  ;;  %v4003_v55 = vld [vmem:[%s2227_s14] sm:$0xff] }
 0x227   : > { %2106 = vmatprep.subr.bf16.mxu0 %v3245_v57  ;;  %2147 = vmatprep.subr.bf16.mxu1 %v3248_v58  ;;  %v2239_v58 = vsub.s32 1, %v3998_v53 }
 0x22e   : > { %2107 = vmatpush1.bf16.xpose.msra.mxu0 %v3243_v60  ;;  %2148 = vmatpush1.bf16.xpose.msra.mxu1 %v3246_v61  ;;  %v2243_v61 = vsub.s32 2, %v3998_v53 }
 0x22f   : > { %2108 = vmatprep.subr.bf16.mxu0 %v3251_v62  ;;  %2149 = vmatprep.subr.bf16.mxu1 %v3254_v63 }
 0x235   : > { %v1962_v4 = vpop.f32.mrf.mxu0  ;;  %v2003_v5 = vpop.f32.mrf.mxu1 }
 0x236   : > { %v3961_v6 = vadd.f32 %v2003_v5, %v1962_v4  ;;  %2109 = vmatpush2.bf16.xpose.msra.mxu0 %v3249_v0  ;;  %2150 = vmatpush2.bf16.xpose.msra.mxu1 %v3252_v1  ;;  %v4009_v0 = vpop.permute.xlu1 %2231  ;;  %v2244_v4 = vrot.slane %v4003_v55, %v2243_v61 }
 0x237   : > { %v1964_v7 = vpop.f32.mrf.mxu0  ;;  %v2005_v8 = vpop.f32.mrf.mxu1  ;;  %2110 = vmatprep.subr.bf16.mxu0 %v3257_v2  ;;  %2151 = vmatprep.subr.bf16.mxu1 %v3260_v3  ;;  %v2240_v2 = vrot.slane %v4003_v55, %v2239_v58 }
 0x238   : > { %v3963_v9 = vadd.f32 %v2005_v8, %v1964_v7  ;;  %v2247_v7 = vsub.s32 3, %v3998_v53  ;;  %vm2267_vm6 = vcmp.eq.s32.totalorder %v4009_v0, %v2244_v4 }
 0x239   : > { %v1966_v10 = vpop.f32.mrf.mxu0  ;;  %v2007_v11 = vpop.f32.mrf.mxu1  ;;  %vm2266_vm4 = vcmp.eq.s32.totalorder %v4009_v0, %v2240_v2 }
 0x23a   : > { %v2251_v10 = vsub.s32 4, %v3998_v53 }
 0x23b   : > { %v1967_v16 = vpop.f32.mrf.mxu0  ;;  %v2008_v17 = vpop.f32.mrf.mxu1 }
 0x23c   : > { %v2252_v16 = vrot.slane %v4003_v55, %v2251_v10 }
 0x23e   : > { %2111 = vmatpush2.bf16.xpose.msra.mxu0 %v3255_v14  ;;  %2152 = vmatpush2.bf16.xpose.msra.mxu1 %v3258_v15  ;;  %v2248_v14 = vrot.slane %v4003_v55, %v2247_v7  ;;  %vm2269_vm13 = vcmp.eq.s32.totalorder %v4009_v0, %v2252_v16  ;;  %v2297_v16 = vld [vmem:[#allocation2] sm:$0xff] }
 0x23f   : > { %2112 = vmatprep.subr.bf16.mxu0 %v3263_v18  ;;  %2153 = vmatprep.subr.bf16.mxu1 %v3266_v19  ;;  %v2255_v18 = vsub.s32 5, %v3998_v53 }
 0x240   : > { %vm2268_vm11 = vcmp.eq.s32.totalorder %v4009_v0, %v2248_v14  ;;  %v2355_v14 = vld [vmem:[#allocation4] sm:$0xff] }
 0x246   : > { %2113 = vmatpush2.bf16.xpose.msra.mxu0 %v3261_v20  ;;  %2154 = vmatpush2.bf16.xpose.msra.mxu1 %v3264_v21  ;;  %v3477_v21 = vmov 0.0  }
 0x247   : > { %2114 = vmatprep.subr.bf16.mxu0 %v3269_v22  ;;  %2155 = vmatprep.subr.bf16.mxu1 %v3272_v23 }
 0x24e   : > { %2115 = vmatpush2.bf16.xpose.msra.mxu0 %v3267_v24  ;;  %2156 = vmatpush2.bf16.xpose.msra.mxu1 %v3270_v25 }
 0x24f   : > { %2116 = vmatprep.subr.bf16.mxu0 %v3275_v26  ;;  %2157 = vmatprep.subr.bf16.mxu1 %v3278_v27  ;;  %v2259_v27 = vsub.s32 6, %v3998_v53 }
 0x256   : > { %2117 = vmatpush2.bf16.xpose.msra.mxu0 %v3273_v28  ;;  %2158 = vmatpush2.bf16.xpose.msra.mxu1 %v3276_v30 }
 0x257   : > { %2118 = vmatprep.subr.bf16.mxu0 %v3281_v32  ;;  %2159 = vmatprep.subr.bf16.mxu1 %v3284_v33  ;;  %v2263_v33 = vsub.s32 7, %v3998_v53 }
 0x25e   : > { %2119 = vmatpush2.bf16.xpose.msra.mxu0 %v3279_v34  ;;  %2160 = vmatpush2.bf16.xpose.msra.mxu1 %v3282_v35 }
 0x25f   : > { %2120 = vmatprep.subr.bf16.mxu0 %v3287_v36  ;;  %2161 = vmatprep.subr.bf16.mxu1 %v3290_v37  ;;  %v2260_v37 = vrot.slane %v4003_v55, %v2259_v27 }
 0x266   : > { %2121 = vmatpush2.bf16.xpose.msra.mxu0 %v3285_v38  ;;  %2162 = vmatpush2.bf16.xpose.msra.mxu1 %v3288_v39 }
 0x267   : > { %2122 = vmatprep.subr.bf16.mxu0 %v3293_v40  ;;  %2163 = vmatprep.subr.bf16.mxu1 %v3296_v41 }
 0x26e   : > { %2123 = vmatpush2.bf16.xpose.msra.mxu0 %v3291_v42  ;;  %2164 = vmatpush2.bf16.xpose.msra.mxu1 %v3294_v29  ;;  %v2264_v42 = vrot.slane %v4003_v55, %v2263_v33 }
 0x275   : > { %2125 = vmatmul.mubr.bf16.vlgmr.msra.gmra.mxu0 %v3777_v12  ;;  %2166 = vmatmul.mubr.bf16.vlgmr.msra.gmra.mxu1 %v3781_v13  ;;  %v2176_v12 = vand.u32 127, %v2175_v52  ;;  %v2235_v13 = vsub.s32 0, %v3998_v53 }
 0x277   : > { %v2177_v57 = vadd.s32 128, %v2176_v12  ;;  %v2178_v60 = vadd.s32 256, %v2176_v12  ;;  %v2185_v62 = vadd.s32 %v4001_v54, %v2176_v12  ;;  %v2236_v63 = vrot.slane %v4003_v55, %v2235_v13 }
 0x278   : > { %v2179_v5 = vadd.s32 384, %v2176_v12  ;;  %v2180_v8 = vadd.s32 512, %v2176_v12  ;;  %v2181_v17 = vadd.s32 640, %v2176_v12  ;;  %v2182_v26 = vadd.s32 768, %v2176_v12 }
 0x279   : > { %v2186_v1 = vadd.s32 %v4001_v54, %v2177_v57  ;;  %v2187_v3 = vadd.s32 %v4001_v54, %v2178_v60  ;;  %vm2193_vm1 = vcmp.lt.s32.totalorder %v2185_v62, 3000  ;;  %vm2265_vm2 = vcmp.eq.s32.totalorder %v4009_v0, %v2236_v63 }
 0x27a   : > { %v2188_v11 = vadd.s32 %v4001_v54, %v2179_v5  ;;  %vm2273_vm7 = vmand %vm2265_vm2, %vm2193_vm1  ;;  %v2189_v15 = vadd.s32 %v4001_v54, %v2180_v8  ;;  %v4031_v19 = vsel %vm2193_vm1, %v3889_v56, -1e+30  ;;  %v2190_v25 = vadd.s32 %v4001_v54, %v2181_v17 }
 0x27b   : > { %vm2194_vm3 = vcmp.lt.s32.totalorder %v2186_v1, 3000  ;;  %vm2195_vm5 = vcmp.lt.s32.totalorder %v2187_v3, 3000  ;;  %v4037_v22 = vsel %vm2273_vm7, 1.0, %v3477_v21  ;;  %v2183_v32 = vadd.s32 896, %v2176_v12 }
 0x27c   : > { %vm2274_vm8 = vmand %vm2266_vm4, %vm2194_vm3  ;;  %vm2196_vm10 = vcmp.lt.s32.totalorder %v2188_v11, 3000  ;;  %v4035_v20 = vsel %vm2194_vm3, %v3891_v59, -1e+30  ;;  %vm2197_vm12 = vcmp.lt.s32.totalorder %v2189_v15, 3000  ;;  %v4047_v56 = vsel %vm2195_vm5, %v3961_v6, -1e+30 }
 0x27d   : > { %vm2275_vm9 = vmand %vm2267_vm6, %vm2195_vm5  ;;  %v4039_v23 = vsel %vm2274_vm8, 1.0, %v3477_v21  ;;  %v2256_v59 = vrot.slane %v4003_v55, %v2255_v18  ;;  %v2356_v28 = vmul.f32 %v4037_v22, %v4031_v19  ;;  %vm2198_vm0 = vcmp.lt.s32.totalorder %v2190_v25, 3000 }
 0x27e   : > { %v4041_v24 = vsel %vm2275_vm9, 1.0, %v3477_v21  ;;  %vm2276_vm14 = vmand %vm2268_vm11, %vm2196_vm10  ;;  %v2357_v30 = vmul.f32 %v4039_v23, %v4035_v20  ;;  %v4064_v35 = vsel %vm2196_vm10, %v3963_v9, -1e+30  ;;  %v2191_v36 = vadd.s32 %v4001_v54, %v2182_v26 }
 0x27f   : > { %v2358_v6 = vmul.f32 %v4041_v24, %v4047_v56  ;;  %v4059_v34 = vsel %vm2276_vm14, 1.0, %v3477_v21  ;;  %vm2277_vm15 = vmand %vm2269_vm13, %vm2197_vm12  ;;  %vm2270_vm1 = vcmp.eq.s32.totalorder %v4009_v0, %v2256_v59  ;;  %v2192_v41 = vadd.s32 %v4001_v54, %v2183_v32 }
 0x280   : > { %v2364_v38 = vadd.f32 %v2357_v30, %v2356_v28  ;;  %v4073_v40 = vsel %vm2277_vm15, 1.0, %v3477_v21  ;;  %v2359_v9 = vmul.f32 %v4059_v34, %v4064_v35  ;;  %vm2278_vm2 = vmand %vm2270_vm1, %vm2198_vm0  ;;  %vm2199_vm3 = vcmp.lt.s32.totalorder %v2191_v36, 3000 }
 0x281   : > { %vm2271_vm4 = vcmp.eq.s32.totalorder %v4009_v0, %v2260_v37  ;;  %vm2200_vm5 = vcmp.lt.s32.totalorder %v2192_v41, 3000  ;;  %vm2272_vm6 = vcmp.eq.s32.totalorder %v4009_v0, %v2264_v42  ;;  %vm2352_vm9 = vcmask 7168  }
 0x282   : > { %v2365_v29 = vadd.f32 %v2364_v38, %v2358_v6  ;;  %vm2279_vm7 = vmand %vm2271_vm4, %vm2199_vm3 }
 0x283   : > { %vm2280_vm8 = vmand %vm2272_vm6, %vm2200_vm5  ;;  %v4094_v52 = vsel %vm2279_vm7, 1.0, %v3477_v21 }
 0x284   : > { %v4097_v54 = vsel %vm2280_vm8, 1.0, %v3477_v21 }
 0x2b5   : > { %v2044_v31 = vpop.f32.mrf.mxu0  ;;  %v2085_v43 = vpop.f32.mrf.mxu1 }
 0x2b6   : > { %v3993_v44 = vadd.f32 %v2085_v43, %v2044_v31 }
 0x2b7   : > { %v2046_v45 = vpop.f32.mrf.mxu0  ;;  %v2087_v46 = vpop.f32.mrf.mxu1 }
 0x2b8   : > { %v3995_v47 = vadd.f32 %v2087_v46, %v2046_v45  ;;  %v4071_v39 = vsel %vm2197_vm12, %v3993_v44, -1e+30  ;;  %v4087_v44 = vsel %vm2278_vm2, 1.0, %v3477_v21  ;;  %v2366_v45 = vadd.f32 %v2365_v29, %v2359_v9 }
 0x2b9   : > { %v2048_v48 = vpop.f32.mrf.mxu0  ;;  %v2089_v49 = vpop.f32.mrf.mxu1  ;;  %v2360_v31 = vmul.f32 %v4073_v40, %v4071_v39  ;;  %v2298_v63 = vmax.f32 %v4031_v19, %v4071_v39 }
 0x2ba   : > { %v4085_v43 = vsel %vm2198_vm0, %v3995_v47, -1e+30 }
 0x2bb   : > { %v2049_v50 = vpop.f32.mrf.mxu0  ;;  %v2090_v51 = vpop.f32.mrf.mxu1  ;;  %v2367_v46 = vadd.f32 %v2366_v45, %v2360_v31  ;;  %v2361_v48 = vmul.f32 %v4087_v44, %v4085_v43  ;;  %v2299_v61 = vmax.f32 %v4035_v20, %v4085_v43 }
 0x2bd   : > { %v2368_v60 = vadd.f32 %v2367_v46, %v2361_v48  ;;  %v2302_v8 = vmax.f32 %v2298_v63, %v2299_v61  ;;  %v2311_v61 = vld [vmem:[#allocation3] sm:$0xff] }
 0x335   : > { %v2126_v49 = vpop.f32.mrf.mxu0  ;;  %v2167_v50 = vpop.f32.mrf.mxu1 }
 0x336   : > { %v2168_v51 = vadd.f32 %v2167_v50, %v2126_v49 }
 0x337   : > { %v2128_v47 = vpop.f32.mrf.mxu0  ;;  %v2169_v53 = vpop.f32.mrf.mxu1 }
 0x338   : > { %v2223_v12 = vsel %vm2199_vm3, %v2168_v51, -1e+30  ;;  %v2170_v13 = vadd.f32 %v2169_v53, %v2128_v47 }
 0x339   : > { %v2362_v55 = vmul.f32 %v4094_v52, %v2223_v12  ;;  %v2130_v57 = vpop.f32.mrf.mxu0  ;;  %v2171_v58 = vpop.f32.mrf.mxu1  ;;  %v2300_v4 = vmax.f32 %v4047_v56, %v2223_v12 }
 0x33a   : > { %v2224_v62 = vsel %vm2200_vm5, %v2170_v13, -1e+30 }
 0x33b   : > { %v2131_v0 = vpop.f32.mrf.mxu0  ;;  %v2172_v1 = vpop.f32.mrf.mxu1  ;;  %v2363_v2 = vmul.f32 %v4097_v54, %v2224_v62  ;;  %v2369_v3 = vadd.f32 %v2368_v60, %v2362_v55  ;;  %v2301_v5 = vmax.f32 %v4064_v35, %v2224_v62 }
 0x33c   : > { %v2375_v1 = vld [vmem:[#allocation5] sm:$0xff] }
 0x33d   : > { %v2370_v7 = vadd.f32 %v2369_v3, %v2363_v2  ;;  %v2303_v10 = vmax.f32 %v2300_v4, %v2301_v5 }
 0x33f   : > { %2371 = vadd.xlane.f32.xlu1 %v2370_v7  ;;  %v2304_v11 = vmax.f32 %v2302_v8, %v2303_v10 }
 0x341   : > { %2305 = vmax.xlane.f32.xlu0 %v2304_v11 }
 0x3c8   : > { %v2372_v15 = vpop.xlane.xlu1 %2371 }
 0x3c9   : > { %v2373_v17 = vadd.f32 %v2372_v15, %v2355_v14 }
 0x3ca   : > { %v2306_v18 = vpop.xlane.xlu0 %2305 }
 0x3cb   : > { %2374 = vst.msk [vmem:[#allocation4] sm:$0xff] %vm2352_vm9, %v2373_v17  ;;  %v2307_v21 = vmax.f32 %v2297_v16, %v2306_v18 }
 0x3cd   : > { %v2308_v25 = vsub.f32 %v2297_v16, %v2307_v21  ;;  %2354 = vst.msk [vmem:[#allocation2] sm:$0xff] %vm2352_vm9, %v2307_v21  ;;  %2315 = vperm.xlu0 %2907, %v2307_v21  }
 0x3cf   : > { %v2309_v60 = vmul.f32 1.442695, %v2308_v25 }
 0x448   : > { %v2316_v59 = vpop.permute.xlu0 %2315 }
 0x449   : > { %v2318_v26 = vsub.f32 %v4031_v19, %v2316_v59  ;;  %v2319_v27 = vsub.f32 %v4035_v20, %v2316_v59  ;;  %v2320_v28 = vsub.f32 %v4047_v56, %v2316_v59  ;;  %v2321_v30 = vsub.f32 %v4064_v35, %v2316_v59 }
 0x44a   : > { %v2322_v6 = vsub.f32 %v4071_v39, %v2316_v59  ;;  %v2323_v37 = vsub.f32 %v4085_v43, %v2316_v59  ;;  %v2324_v41 = vsub.f32 %v2223_v12, %v2316_v59  ;;  %v2325_v19 = vsub.f32 %v2224_v62, %v2316_v59 }
 0x44b   : > { %v2326_v32 = vmul.f32 1.442695, %v2318_v26  ;;  %v2328_v33 = vmul.f32 1.442695, %v2319_v27  ;;  %v2330_v36 = vmul.f32 1.442695, %v2320_v28  ;;  %v2376_v56 = vadd.f32 %v4039_v23, %v4037_v22 }
 0x44c   : > { %v2332_v38 = vmul.f32 1.442695, %v2321_v30  ;;  %v2334_v42 = vmul.f32 1.442695, %v2322_v6  ;;  %v2336_v20 = vmul.f32 1.442695, %v2323_v37 }
 0x44d   : > { %3297 = vpow2.f32 %v2326_v32  ;;  %v2338_v35 = vmul.f32 1.442695, %v2324_v41  ;;  %v2340_v29 = vmul.f32 1.442695, %v2325_v19  ;;  %v2377_v39 = vadd.f32 %v4041_v24, %v2376_v56 }
 0x44e   : > { %3299 = vpow2.f32 %v2328_v33 }
 0x44f   : > { %3301 = vpow2.f32 %v2330_v36  ;;  %v2378_v43 = vadd.f32 %v4059_v34, %v2377_v39 }
 0x450   : > { %3303 = vpow2.f32 %v2332_v38 }
 0x451   : > { %3305 = vpow2.f32 %v2334_v42  ;;  %v2379_v50 = vadd.f32 %v4073_v40, %v2378_v43 }
 0x452   : > { %3307 = vpow2.f32 %v2336_v20 }
 0x453   : > { %3309 = vpow2.f32 %v2338_v35  ;;  %v2380_v12 = vadd.f32 %v4087_v44, %v2379_v50 }
 0x454   : > { %3311 = vpow2.f32 %v2340_v29 }
 0x455   : > { %v2381_v58 = vadd.f32 %v4094_v52, %v2380_v12  ;;  %3313 = vpow2.f32 %v2309_v60 }
 0x457   : > { %v2382_v34 = vadd.f32 %v4097_v54, %v2381_v58 }
 0x45a   : > { %v3298_v9 = vpop.eup %3297 }
 0x45b   : > { %v3300_v31 = vpop.eup %3299 }
 0x45c   : > { %v2342_v45 = vadd.f32 %v3300_v31, %v3298_v9  ;;  %v3302_v46 = vpop.eup %3301 }
 0x45d   : > { %v3304_v49 = vpop.eup %3303 }
 0x45e   : > { %v2343_v48 = vadd.f32 %v3302_v46, %v2342_v45  ;;  %v3306_v22 = vpop.eup %3305 }
 0x45f   : > { %v3308_v47 = vpop.eup %3307 }
 0x460   : > { %v2344_v51 = vadd.f32 %v3304_v49, %v2343_v48  ;;  %v3310_v24 = vpop.eup %3309 }
 0x461   : > { %v3312_v55 = vpop.eup %3311 }
 0x462   : > { %v2345_v23 = vadd.f32 %v3306_v22, %v2344_v51  ;;  %v3314_v40 = vpop.eup %3313 }
 0x463   : > { %v2312_v62 = vmul.f32 %v3314_v40, %v2311_v61 }
 0x464   : > { %v2346_v53 = vadd.f32 %v3308_v47, %v2345_v23 }
 0x466   : > { %v2347_v13 = vadd.f32 %v3310_v24, %v2346_v53 }
 0x468   : > { %v2348_v57 = vadd.f32 %v3312_v55, %v2347_v13 }
 0x46a   : > { %2349 = vadd.xlane.f32.xlu1 %v2348_v57 }
 0x46e   : > { %2383 = vadd.xlane.f32.xlu1 %v2382_v34 }
 0x4f3   : > { %v2350_v63 = vpop.xlane.xlu1 %2349 }
 0x4f4   : > { %v2351_v0 = vadd.f32 %v2350_v63, %v2312_v62 }
 0x4f6   : > { %2353 = vst.msk [vmem:[#allocation3] sm:$0xff] %vm2352_vm9, %v2351_v0  ;;  %2390 = sbr.rel (%p2806_p2) target bundleno = 1399 (0x577), region = 56 }
 0x4f7   : > { %v2384_v44 = vpop.xlane.xlu1 %2383 }
 0x4f8   : > { %v2385_v2 = vadd.f32 %v2384_v44, %v2375_v1 }
 0x4fa   : > { %2386 = vst.msk [vmem:[#allocation5] sm:$0xff] %vm2352_vm9, %v2385_v2 }
 0x4fb   : > { %v2391_v3 = vld [vmem:[#allocation2] sm:$0xff]  ;;  %v2400_v4 = vld [vmem:[#allocation4] sm:$0xff]  ;;  %vm2398_vm10 = vcmask 15368   ;;  %vm2405_vm11 = vcmask 23568   ;;  %vm2412_vm12 = vcmask 31768  }
 0x4fc   : > { %2392 = vst.msk [vmem:[%s3687_s7] sm:$0xff] %vm2352_vm9, %v2391_v3 }
 0x4fd   : > { %v2393_v52 = vld [vmem:[#allocation3] sm:$0xff] }
 0x4fe   : > { %2395 = vrot.lane.b32.xlu0 %v2393_v52, %s3478_s11 }
 0x501   : > { %v2407_v54 = vld [vmem:[#allocation5] sm:$0xff] }
 0x502   : > { %2409 = vrot.lane.b32.xlu1 %v2407_v54, %s3479_s26  ;;  %2402 = vrot.lane.b32.xlu0 %v2400_v4, %s3480_s15 }
 0x570   : > { %v2396_v5 = vpop.permute.xlu0 %2395 }
 0x571   : > { %2399 = vst.msk [vmem:[%s3687_s7] sm:$0xff] %vm2398_vm10, %v2396_v5 }
 0x574   : > { %v2410_v7 = vpop.permute.xlu1 %2409  ;;  %v2403_v8 = vpop.permute.xlu0 %2402 }
 0x575   : > { %2406 = vst.msk [vmem:[%s3687_s7] sm:$0xff] %vm2405_vm11, %v2403_v8 }
 0x576   : > { %2413 = vst.msk [vmem:[%s3687_s7] sm:$0xff] %vm2412_vm12, %v2410_v7 }
 0x577 PF: > { %s18_s22 = sadd.s32 1, %s3467_s22   ;;  %s4176_s15 = smov %s3443_s16 }
 0x578   : > { %p15_p9 = scmp.ge.s32.totalorder %s18_s22, 6   ;;  %s4177_s16 = smov %s3447_s17 }
 0x579   : > { %s4178_s17 = smov %s3592_s12  ;;  %s4179_s18 = smov %s3459_s20 }
 0x57a   : > { %s4180_s19 = smov %s3463_s21  ;;  %s4181_s20 = smov %s4184_s24 }
 0x57b   : > { %s4182_s21 = smov %s4188_s25  ;;  %17 = sbr.rel (!%p15_p9) target bundleno = 6 (0x6), region = 94 }
 0x580   :  { %2433 = vsyncpa [#allocation7], 1 }
 0x581   :  { %2435 = vsyncpa [#allocation7 + $0x1], 1 }
 0x582   :  { %2436 = vsyncpa [#allocation9], 1 }
 0x583   :  { %2438 = vsyncpa [#allocation9 + $0x1], 1 }

</bundles_post_ra>
